<compile_context>
chip_gen: v7x
topology: tpu7x:2x2x1
jax: 0.10.0
libtpu: 0.0.40
codegen_flags: <defaults>
</compile_context>

<pallas_src>
import functools

import jax
import jax.numpy as jnp
from jax.experimental import pallas as pl
from jax.experimental.pallas import tpu as pltpu

# ---------------- problem sizes (small, consistent with the module) ----------------
N = 2          # batch
CIN = 4        # in_channels
L = 16         # sequence length
C1 = 8         # branch 1 output channels
C2 = (6, 8)    # branch 2: 1x1 reduce -> k=5 conv
C3 = (6, 8)    # branch 3: 1x1 reduce -> k=23 conv
C4 = 8         # branch 4 output channels (after avg-pool)
CTOT = C1 + C2[1] + C3[1] + C4          # 32
CRED = C1 + C2[0] + C3[0]               # 20 (channels that get bias+relu before k-conv)

K2, PAD2 = 5, 2
K3, PAD3 = 23, 11   # also the global L-padding applied to the input
POOL_K = 3
LP = L + 2 * PAD3   # padded length = 38


def inception_kernel(x_ref, wcat_ref, bcat_ref, w2b_ref, w3b_ref, out_ref):
    # x_ref:   (N*LP, CIN)   input, zero padded by PAD3 on both ends of L, batch-flat
    # wcat:    (CIN, 28)     [w1 | w2a | w3a | w4] fused 1x1 weights
    # bcat:    (4, 20)       row0 = [b1|b2a|b3a], row1 = b2b, row2 = b3b, row3 = b4
    # w2b:     (K2*C2[0], C2[1]) = (30, 8)   im2col-flattened k=5 weight
    # w3b:     (K3*C3[0], C3[1]) = (138, 8)  im2col-flattened k=23 weight
    # out_ref: (N*L, CTOT)
    xflat = x_ref[...]
    wcat = wcat_ref[...]
    bc = bcat_ref[...]
    b123 = bc[0:1, :]                      # (1, 20)
    b2b = bc[1:2, 0:C2[1]]                 # (1, 8)
    b3b = bc[2:3, 0:C3[1]]                 # (1, 8)
    b4 = bc[3:4, 0:C4]                     # (1, 8)
    w2b = w2b_ref[...]
    w3b = w3b_ref[...]

    # ---- fused 1x1 convs for all four branches and the whole batch: 1 MXU push ----
    hraw = jnp.dot(xflat, wcat, preferred_element_type=jnp.float32)      # (N*LP, 28)

    # One shared validity mask over the (batch-flattened) padded rows.
    idx = jax.lax.broadcasted_iota(jnp.int32, (N * LP, 1), 0)
    valid = idx < 0                                                       # all False
    for n in range(N):                                                    # static OR
        base = n * LP + PAD3
        valid = valid | ((idx >= base) & (idx < base + L))

    # Branches 1/2/3: bias + relu, then zero the padded rows (they must act as the
    # zero padding of the k-tap convs, and bias/relu made them nonzero).
    h123 = jnp.maximum(hraw[:, 0:CRED] + b123, 0.0)
    h123 = jnp.where(valid, h123, 0.0)

    # ---- branch 1: just the valid rows of the first C1 channels ----
    p1 = jnp.concatenate(
        [h123[n * LP + PAD3: n * LP + PAD3 + L, 0:C1] for n in range(N)], axis=0)

    # ---- batched im2col (static slices; per-batch windows never cross batches
    #      because PAD3 >= pad for both tap convs) ----
    def im2col(col0, ncols, K, pad):
        blocks = []
        for n in range(N):
            base = n * LP + PAD3 - pad
            taps = [h123[base + k: base + k + L, col0:col0 + ncols] for k in range(K)]
            blocks.append(jnp.concatenate(taps, axis=1))                  # (L, K*ncols)
        return jnp.concatenate(blocks, axis=0)                            # (N*L, K*ncols)

    # ---- branch 2: im2col + single matmul (contraction depth 30) ----
    H2 = im2col(C1, C2[0], K2, PAD2)                                      # (N*L, 30)
    p2 = jnp.maximum(
        jnp.dot(H2, w2b, preferred_element_type=jnp.float32) + b2b, 0.0)

    # ---- branch 3: im2col + single matmul (contraction depth 138) ----
    H3 = im2col(C1 + C2[0], C3[0], K3, PAD3)                              # (N*L, 138)
    p3 = jnp.maximum(
        jnp.dot(H3, w3b, preferred_element_type=jnp.float32) + b3b, 0.0)

    # ---- branch 4: pool(x @ w4) == pool(x) @ w4 (both linear); padded rows of
    #      hraw[:, 20:28] are exactly zero (no bias yet), matching AvgPool1d padding.
    y4 = hraw[:, CRED:CRED + C4]                                          # (N*LP, 8)
    pooled_blocks = []
    for n in range(N):
        base = n * LP + PAD3
        pooled_blocks.append(
            (y4[base - 1: base - 1 + L, :]
             + y4[base: base + L, :]
             + y4[base + 1: base + 1 + L, :]) * (1.0 / POOL_K))
    pooled = jnp.concatenate(pooled_blocks, axis=0)                       # (N*L, 8)
    p4 = jnp.maximum(pooled + b4, 0.0)

    # ---- single lane-dense concatenated store for the whole batch ----
    out_ref[...] = jnp.concatenate([p1, p2, p3, p4], axis=1).astype(out_ref.dtype)


@functools.partial(jax.jit, static_argnames=())
def inception_forward(x_ncl, params):
    """x_ncl: (N, CIN, L) float32 (PyTorch NCL layout).  Returns (N, CTOT, L)."""
    (w1, b1, w2a, b2a, w2b, b2b, w3a, b3a, w3b, b3b, w4, b4) = params

    # glue: NCL -> NLC, pad L by PAD3 with zeros, flatten batch into sublanes.
    x_nlc = jnp.transpose(x_ncl, (0, 2, 1)).astype(jnp.float32)
    x_pad = jnp.pad(x_nlc, ((0, 0), (PAD3, PAD3), (0, 0)))                # (N, LP, CIN)
    x_flat = x_pad.reshape(N * LP, CIN)                                   # (N*LP, CIN)

    # pack params: one 1x1-weight slab, one bias slab, two flattened tap weights.
    wcat = jnp.concatenate([w1, w2a, w3a, w4], axis=1)                    # (CIN, 28)
    bcat = jnp.zeros((4, CRED), jnp.float32)
    bcat = bcat.at[0, :].set(jnp.concatenate([b1[0], b2a[0], b3a[0]]))    # (20,)
    bcat = bcat.at[1, :C2[1]].set(b2b[0])
    bcat = bcat.at[2, :C3[1]].set(b3b[0])
    bcat = bcat.at[3, :C4].set(b4[0])
    w2b_flat = w2b.reshape(K2 * C2[0], C2[1])                             # (30, 8)
    w3b_flat = w3b.reshape(K3 * C3[0], C3[1])                             # (138, 8)

    def full_spec(shape):
        return pl.BlockSpec(shape, lambda i: (0,) * len(shape))

    out_flat = pl.pallas_call(
        inception_kernel,
        out_shape=jax.ShapeDtypeStruct((N * L, CTOT), jnp.float32),
        grid=(1,),                                       # whole problem in one step
        in_specs=[
            full_spec((N * LP, CIN)),
            full_spec(wcat.shape),
            full_spec(bcat.shape),
            full_spec(w2b_flat.shape),
            full_spec(w3b_flat.shape),
        ],
        out_specs=full_spec((N * L, CTOT)),
        compiler_params=pltpu.CompilerParams(
            dimension_semantics=("arbitrary",)),
    )(x_flat, wcat, bcat, w2b_flat, w3b_flat)

    out_nlc = out_flat.reshape(N, L, CTOT)
    return jnp.transpose(out_nlc, (0, 2, 1))   # back to (N, CTOT, L)


# ---------------- pure-JAX reference (mirrors the PyTorch forward) ----------------
def ref_inception(x_ncl, params):
    (w1, b1, w2a, b2a, w2b, b2b, w3a, b3a, w3b, b3b, w4, b4) = params

    def conv1x1(x, w, b):          # w: (Cin, Cout)
        return jnp.einsum('nil,io->nol', x, w) + b.reshape(1, -1, 1)

    def convk(x, w, b, pad):       # w: (K, Cin, Cout)
        wt = jnp.transpose(w, (2, 1, 0))   # (Cout, Cin, K), cross-correlation like torch
        y = jax.lax.conv_general_dilated(
            x, wt, window_strides=(1,), padding=[(pad, pad)],
            dimension_numbers=('NCH', 'OIH', 'NCH'))
        return y + b.reshape(1, -1, 1)

    relu = lambda v: jnp.maximum(v, 0.0)
    p1 = relu(conv1x1(x_ncl, w1, b1[0]))
    p2 = relu(convk(relu(conv1x1(x_ncl, w2a, b2a[0])), w2b, b2b[0], PAD2))
    p3 = relu(convk(relu(conv1x1(x_ncl, w3a, b3a[0])), w3b, b3b[0], PAD3))
    xpad = jnp.pad(x_ncl, ((0, 0), (0, 0), (1, 1)))
    pooled = (xpad[:, :, 0:L] + xpad[:, :, 1:L + 1] + xpad[:, :, 2:L + 2]) / POOL_K
    p4 = relu(conv1x1(pooled, w4, b4[0]))
    return jnp.concatenate([p1, p2, p3, p4], axis=1)


def make_params(key):
    ks = jax.random.split(key, 12)
    s = 0.1
    w1 = s * jax.random.normal(ks[0], (CIN, C1), jnp.float32)
    b1 = s * jax.random.normal(ks[1], (1, C1), jnp.float32)
    w2a = s * jax.random.normal(ks[2], (CIN, C2[0]), jnp.float32)
    b2a = s * jax.random.normal(ks[3], (1, C2[0]), jnp.float32)
    w2b = s * jax.random.normal(ks[4], (K2, C2[0], C2[1]), jnp.float32)
    b2b = s * jax.random.normal(ks[5], (1, C2[1]), jnp.float32)
    w3a = s * jax.random.normal(ks[6], (CIN, C3[0]), jnp.float32)
    b3a = s * jax.random.normal(ks[7], (1, C3[0]), jnp.float32)
    w3b = s * jax.random.normal(ks[8], (K3, C3[0], C3[1]), jnp.float32)
    b3b = s * jax.random.normal(ks[9], (1, C3[1]), jnp.float32)
    w4 = s * jax.random.normal(ks[10], (CIN, C4), jnp.float32)
    b4 = s * jax.random.normal(ks[11], (1, C4), jnp.float32)
    return (w1, b1, w2a, b2a, w2b, b2b, w3a, b3a, w3b, b3b, w4, b4)


if __name__ == "__main__":
    key = jax.random.PRNGKey(0)
    kx, kp = jax.random.split(key)
    x = jax.random.normal(kx, (N, CIN, L), jnp.float32)
    params = make_params(kp)

    out = inception_forward(x, params)
    out = jax.block_until_ready(out)

    ref = ref_inception(x, params)
    assert out.shape == (N, CTOT, L), out.shape
    assert jnp.allclose(out, ref, atol=1e-4, rtol=1e-4), float(jnp.max(jnp.abs(out - ref)))
    print("KERNEL_OK")
</pallas_src>

<mosaic_0001>
module attributes {stable_mosaic.version = 11 : i64} {
  func.func @inception_kernel(%arg0: i32, %arg1: memref<76x4xf32, #tpu.memory_space<vmem>>, %arg2: memref<4x28xf32, #tpu.memory_space<vmem>>, %arg3: memref<4x20xf32, #tpu.memory_space<vmem>>, %arg4: memref<30x8xf32, #tpu.memory_space<vmem>>, %arg5: memref<138x8xf32, #tpu.memory_space<vmem>>, %arg6: memref<32x32xf32, #tpu.memory_space<vmem>>) attributes {dimension_semantics = [#tpu.dimension_semantics<arbitrary>], iteration_bounds = array<i64: 1>, scalar_prefetch = 0 : i64, scratch_operands = 0 : i64, tpu.core_type = #tpu.core_type<tc>, window_params = [{pipeline_mode = #tpu.pipeline_mode<synchronous>, transform_indices = @transform_0, window_bounds = array<i64: 76, 4>}, {pipeline_mode = #tpu.pipeline_mode<synchronous>, transform_indices = @transform_1, window_bounds = array<i64: 4, 28>}, {pipeline_mode = #tpu.pipeline_mode<synchronous>, transform_indices = @transform_2, window_bounds = array<i64: 4, 20>}, {pipeline_mode = #tpu.pipeline_mode<synchronous>, transform_indices = @transform_3, window_bounds = array<i64: 30, 8>}, {pipeline_mode = #tpu.pipeline_mode<synchronous>, transform_indices = @transform_4, window_bounds = array<i64: 138, 8>}, {pipeline_mode = #tpu.pipeline_mode<synchronous>, transform_indices = @transform_5, window_bounds = array<i64: 32, 32>}]} {
    %c0 = arith.constant 0 : index
    %c0_0 = arith.constant 0 : index
    %0 = vector.load %arg1[%c0, %c0_0] : memref<76x4xf32, #tpu.memory_space<vmem>>, vector<76x4xf32>
    %c0_1 = arith.constant 0 : index
    %c0_2 = arith.constant 0 : index
    %1 = vector.load %arg2[%c0_1, %c0_2] : memref<4x28xf32, #tpu.memory_space<vmem>>, vector<4x28xf32>
    %c0_3 = arith.constant 0 : index
    %c0_4 = arith.constant 0 : index
    %2 = vector.load %arg3[%c0_3, %c0_4] : memref<4x20xf32, #tpu.memory_space<vmem>>, vector<4x20xf32>
    %3 = vector.extract_strided_slice %2 {offsets = [0, 0], sizes = [1, 20], strides = [1, 1]} : vector<4x20xf32> to vector<1x20xf32>
    %4 = vector.extract_strided_slice %2 {offsets = [1, 0], sizes = [1, 8], strides = [1, 1]} : vector<4x20xf32> to vector<1x8xf32>
    %5 = vector.extract_strided_slice %2 {offsets = [2, 0], sizes = [1, 8], strides = [1, 1]} : vector<4x20xf32> to vector<1x8xf32>
    %6 = vector.extract_strided_slice %2 {offsets = [3, 0], sizes = [1, 8], strides = [1, 1]} : vector<4x20xf32> to vector<1x8xf32>
    %c0_5 = arith.constant 0 : index
    %c0_6 = arith.constant 0 : index
    %7 = vector.load %arg4[%c0_5, %c0_6] : memref<30x8xf32, #tpu.memory_space<vmem>>, vector<30x8xf32>
    %c0_7 = arith.constant 0 : index
    %c0_8 = arith.constant 0 : index
    %8 = vector.load %arg5[%c0_7, %c0_8] : memref<138x8xf32, #tpu.memory_space<vmem>>, vector<138x8xf32>
    %cst = arith.constant dense<0.000000e+00> : vector<76x28xf32>
    %9 = tpu.matmul %0, %1, %cst {dimension_numbers = #tpu.dot_dimension_numbers<[1], [0], [0], [1], [0, 0, 1, 1], [], []>} : vector<76x4xf32>, vector<4x28xf32>, vector<76x28xf32> -> vector<76x28xf32>
    %10 = tpu.iota {dimensions = array<i32: 0>} : vector<76x1xi32>
    %c0_i32 = arith.constant 0 : i32
    %11 = vector.broadcast %c0_i32 : i32 to vector<76x1xi32>
    %12 = arith.cmpi slt, %10, %11 : vector<76x1xi32>
    %c11_i32 = arith.constant 11 : i32
    %13 = vector.broadcast %c11_i32 : i32 to vector<76x1xi32>
    %14 = arith.cmpi sge, %10, %13 : vector<76x1xi32>
    %c27_i32 = arith.constant 27 : i32
    %15 = vector.broadcast %c27_i32 : i32 to vector<76x1xi32>
    %16 = arith.cmpi slt, %10, %15 : vector<76x1xi32>
    %17 = arith.andi %14, %16 : vector<76x1xi1>
    %18 = arith.ori %12, %17 : vector<76x1xi1>
    %c49_i32 = arith.constant 49 : i32
    %19 = vector.broadcast %c49_i32 : i32 to vector<76x1xi32>
    %20 = arith.cmpi sge, %10, %19 : vector<76x1xi32>
    %c65_i32 = arith.constant 65 : i32
    %21 = vector.broadcast %c65_i32 : i32 to vector<76x1xi32>
    %22 = arith.cmpi slt, %10, %21 : vector<76x1xi32>
    %23 = arith.andi %20, %22 : vector<76x1xi1>
    %24 = arith.ori %18, %23 : vector<76x1xi1>
    %25 = vector.extract_strided_slice %9 {offsets = [0, 0], sizes = [76, 20], strides = [1, 1]} : vector<76x28xf32> to vector<76x20xf32>
    %26 = vector.broadcast %3 : vector<1x20xf32> to vector<76x20xf32>
    %27 = arith.addf %25, %26 : vector<76x20xf32>
    %cst_9 = arith.constant 0.000000e+00 : f32
    %28 = vector.broadcast %cst_9 : f32 to vector<76x20xf32>
    %29 = arith.maximumf %27, %28 : vector<76x20xf32>
    %cst_10 = arith.constant 0.000000e+00 : f32
    %30 = vector.shape_cast %24 : vector<76x1xi1> to vector<76x1xi1>
    %31 = vector.broadcast %30 : vector<76x1xi1> to vector<76x20xi1>
    %32 = vector.broadcast %cst_10 : f32 to vector<76x20xf32>
    %33 = arith.select %31, %29, %32 : vector<76x20xi1>, vector<76x20xf32>
    %34 = vector.extract_strided_slice %33 {offsets = [11, 0], sizes = [16, 8], strides = [1, 1]} : vector<76x20xf32> to vector<16x8xf32>
    %35 = vector.extract_strided_slice %33 {offsets = [49, 0], sizes = [16, 8], strides = [1, 1]} : vector<76x20xf32> to vector<16x8xf32>
    %36 = tpu.concatenate %34, %35 in 0 : vector<16x8xf32>, vector<16x8xf32> -> vector<32x8xf32>
    %37 = vector.extract_strided_slice %33 {offsets = [9, 8], sizes = [16, 6], strides = [1, 1]} : vector<76x20xf32> to vector<16x6xf32>
    %38 = vector.extract_strided_slice %33 {offsets = [10, 8], sizes = [16, 6], strides = [1, 1]} : vector<76x20xf32> to vector<16x6xf32>
    %39 = vector.extract_strided_slice %33 {offsets = [11, 8], sizes = [16, 6], strides = [1, 1]} : vector<76x20xf32> to vector<16x6xf32>
    %40 = vector.extract_strided_slice %33 {offsets = [12, 8], sizes = [16, 6], strides = [1, 1]} : vector<76x20xf32> to vector<16x6xf32>
    %41 = vector.extract_strided_slice %33 {offsets = [13, 8], sizes = [16, 6], strides = [1, 1]} : vector<76x20xf32> to vector<16x6xf32>
    %42 = tpu.concatenate %37, %38, %39, %40, %41 in 1 : vector<16x6xf32>, vector<16x6xf32>, vector<16x6xf32>, vector<16x6xf32>, vector<16x6xf32> -> vector<16x30xf32>
    %43 = vector.extract_strided_slice %33 {offsets = [47, 8], sizes = [16, 6], strides = [1, 1]} : vector<76x20xf32> to vector<16x6xf32>
    %44 = vector.extract_strided_slice %33 {offsets = [48, 8], sizes = [16, 6], strides = [1, 1]} : vector<76x20xf32> to vector<16x6xf32>
    %45 = vector.extract_strided_slice %33 {offsets = [49, 8], sizes = [16, 6], strides = [1, 1]} : vector<76x20xf32> to vector<16x6xf32>
    %46 = vector.extract_strided_slice %33 {offsets = [50, 8], sizes = [16, 6], strides = [1, 1]} : vector<76x20xf32> to vector<16x6xf32>
    %47 = vector.extract_strided_slice %33 {offsets = [51, 8], sizes = [16, 6], strides = [1, 1]} : vector<76x20xf32> to vector<16x6xf32>
    %48 = tpu.concatenate %43, %44, %45, %46, %47 in 1 : vector<16x6xf32>, vector<16x6xf32>, vector<16x6xf32>, vector<16x6xf32>, vector<16x6xf32> -> vector<16x30xf32>
    %49 = tpu.concatenate %42, %48 in 0 : vector<16x30xf32>, vector<16x30xf32> -> vector<32x30xf32>
    %cst_11 = arith.constant dense<0.000000e+00> : vector<32x8xf32>
    %50 = tpu.matmul %49, %7, %cst_11 {dimension_numbers = #tpu.dot_dimension_numbers<[1], [0], [0], [1], [0, 0, 1, 1], [], []>} : vector<32x30xf32>, vector<30x8xf32>, vector<32x8xf32> -> vector<32x8xf32>
    %51 = vector.broadcast %4 : vector<1x8xf32> to vector<32x8xf32>
    %52 = arith.addf %50, %51 : vector<32x8xf32>
    %cst_12 = arith.constant 0.000000e+00 : f32
    %53 = vector.broadcast %cst_12 : f32 to vector<32x8xf32>
    %54 = arith.maximumf %52, %53 : vector<32x8xf32>
    %55 = vector.extract_strided_slice %33 {offsets = [0, 14], sizes = [16, 6], strides = [1, 1]} : vector<76x20xf32> to vector<16x6xf32>
    %56 = vector.extract_strided_slice %33 {offsets = [1, 14], sizes = [16, 6], strides = [1, 1]} : vector<76x20xf32> to vector<16x6xf32>
    %57 = vector.extract_strided_slice %33 {offsets = [2, 14], sizes = [16, 6], strides = [1, 1]} : vector<76x20xf32> to vector<16x6xf32>
    %58 = vector.extract_strided_slice %33 {offsets = [3, 14], sizes = [16, 6], strides = [1, 1]} : vector<76x20xf32> to vector<16x6xf32>
    %59 = vector.extract_strided_slice %33 {offsets = [4, 14], sizes = [16, 6], strides = [1, 1]} : vector<76x20xf32> to vector<16x6xf32>
    %60 = vector.extract_strided_slice %33 {offsets = [5, 14], sizes = [16, 6], strides = [1, 1]} : vector<76x20xf32> to vector<16x6xf32>
    %61 = vector.extract_strided_slice %33 {offsets = [6, 14], sizes = [16, 6], strides = [1, 1]} : vector<76x20xf32> to vector<16x6xf32>
    %62 = vector.extract_strided_slice %33 {offsets = [7, 14], sizes = [16, 6], strides = [1, 1]} : vector<76x20xf32> to vector<16x6xf32>
    %63 = vector.extract_strided_slice %33 {offsets = [8, 14], sizes = [16, 6], strides = [1, 1]} : vector<76x20xf32> to vector<16x6xf32>
    %64 = vector.extract_strided_slice %33 {offsets = [9, 14], sizes = [16, 6], strides = [1, 1]} : vector<76x20xf32> to vector<16x6xf32>
    %65 = vector.extract_strided_slice %33 {offsets = [10, 14], sizes = [16, 6], strides = [1, 1]} : vector<76x20xf32> to vector<16x6xf32>
    %66 = vector.extract_strided_slice %33 {offsets = [11, 14], sizes = [16, 6], strides = [1, 1]} : vector<76x20xf32> to vector<16x6xf32>
    %67 = vector.extract_strided_slice %33 {offsets = [12, 14], sizes = [16, 6], strides = [1, 1]} : vector<76x20xf32> to vector<16x6xf32>
    %68 = vector.extract_strided_slice %33 {offsets = [13, 14], sizes = [16, 6], strides = [1, 1]} : vector<76x20xf32> to vector<16x6xf32>
    %69 = vector.extract_strided_slice %33 {offsets = [14, 14], sizes = [16, 6], strides = [1, 1]} : vector<76x20xf32> to vector<16x6xf32>
    %70 = vector.extract_strided_slice %33 {offsets = [15, 14], sizes = [16, 6], strides = [1, 1]} : vector<76x20xf32> to vector<16x6xf32>
    %71 = vector.extract_strided_slice %33 {offsets = [16, 14], sizes = [16, 6], strides = [1, 1]} : vector<76x20xf32> to vector<16x6xf32>
    %72 = vector.extract_strided_slice %33 {offsets = [17, 14], sizes = [16, 6], strides = [1, 1]} : vector<76x20xf32> to vector<16x6xf32>
    %73 = vector.extract_strided_slice %33 {offsets = [18, 14], sizes = [16, 6], strides = [1, 1]} : vector<76x20xf32> to vector<16x6xf32>
    %74 = vector.extract_strided_slice %33 {offsets = [19, 14], sizes = [16, 6], strides = [1, 1]} : vector<76x20xf32> to vector<16x6xf32>
    %75 = vector.extract_strided_slice %33 {offsets = [20, 14], sizes = [16, 6], strides = [1, 1]} : vector<76x20xf32> to vector<16x6xf32>
    %76 = vector.extract_strided_slice %33 {offsets = [21, 14], sizes = [16, 6], strides = [1, 1]} : vector<76x20xf32> to vector<16x6xf32>
    %77 = vector.extract_strided_slice %33 {offsets = [22, 14], sizes = [16, 6], strides = [1, 1]} : vector<76x20xf32> to vector<16x6xf32>
    %78 = tpu.concatenate %55, %56, %57, %58, %59, %60, %61, %62, %63, %64, %65, %66, %67, %68, %69, %70 in 1 : vector<16x6xf32>, vector<16x6xf32>, vector<16x6xf32>, vector<16x6xf32>, vector<16x6xf32>, vector<16x6xf32>, vector<16x6xf32>, vector<16x6xf32>, vector<16x6xf32>, vector<16x6xf32>, vector<16x6xf32>, vector<16x6xf32>, vector<16x6xf32>, vector<16x6xf32>, vector<16x6xf32>, vector<16x6xf32> -> vector<16x96xf32>
    %79 = tpu.concatenate %71, %72, %73, %74, %75, %76, %77 in 1 : vector<16x6xf32>, vector<16x6xf32>, vector<16x6xf32>, vector<16x6xf32>, vector<16x6xf32>, vector<16x6xf32>, vector<16x6xf32> -> vector<16x42xf32>
    %80 = tpu.concatenate %78, %79 in 1 : vector<16x96xf32>, vector<16x42xf32> -> vector<16x138xf32>
    %81 = vector.extract_strided_slice %33 {offsets = [38, 14], sizes = [16, 6], strides = [1, 1]} : vector<76x20xf32> to vector<16x6xf32>
    %82 = vector.extract_strided_slice %33 {offsets = [39, 14], sizes = [16, 6], strides = [1, 1]} : vector<76x20xf32> to vector<16x6xf32>
    %83 = vector.extract_strided_slice %33 {offsets = [40, 14], sizes = [16, 6], strides = [1, 1]} : vector<76x20xf32> to vector<16x6xf32>
    %84 = vector.extract_strided_slice %33 {offsets = [41, 14], sizes = [16, 6], strides = [1, 1]} : vector<76x20xf32> to vector<16x6xf32>
    %85 = vector.extract_strided_slice %33 {offsets = [42, 14], sizes = [16, 6], strides = [1, 1]} : vector<76x20xf32> to vector<16x6xf32>
    %86 = vector.extract_strided_slice %33 {offsets = [43, 14], sizes = [16, 6], strides = [1, 1]} : vector<76x20xf32> to vector<16x6xf32>
    %87 = vector.extract_strided_slice %33 {offsets = [44, 14], sizes = [16, 6], strides = [1, 1]} : vector<76x20xf32> to vector<16x6xf32>
    %88 = vector.extract_strided_slice %33 {offsets = [45, 14], sizes = [16, 6], strides = [1, 1]} : vector<76x20xf32> to vector<16x6xf32>
    %89 = vector.extract_strided_slice %33 {offsets = [46, 14], sizes = [16, 6], strides = [1, 1]} : vector<76x20xf32> to vector<16x6xf32>
    %90 = vector.extract_strided_slice %33 {offsets = [47, 14], sizes = [16, 6], strides = [1, 1]} : vector<76x20xf32> to vector<16x6xf32>
    %91 = vector.extract_strided_slice %33 {offsets = [48, 14], sizes = [16, 6], strides = [1, 1]} : vector<76x20xf32> to vector<16x6xf32>
    %92 = vector.extract_strided_slice %33 {offsets = [49, 14], sizes = [16, 6], strides = [1, 1]} : vector<76x20xf32> to vector<16x6xf32>
    %93 = vector.extract_strided_slice %33 {offsets = [50, 14], sizes = [16, 6], strides = [1, 1]} : vector<76x20xf32> to vector<16x6xf32>
    %94 = vector.extract_strided_slice %33 {offsets = [51, 14], sizes = [16, 6], strides = [1, 1]} : vector<76x20xf32> to vector<16x6xf32>
    %95 = vector.extract_strided_slice %33 {offsets = [52, 14], sizes = [16, 6], strides = [1, 1]} : vector<76x20xf32> to vector<16x6xf32>
    %96 = vector.extract_strided_slice %33 {offsets = [53, 14], sizes = [16, 6], strides = [1, 1]} : vector<76x20xf32> to vector<16x6xf32>
    %97 = vector.extract_strided_slice %33 {offsets = [54, 14], sizes = [16, 6], strides = [1, 1]} : vector<76x20xf32> to vector<16x6xf32>
    %98 = vector.extract_strided_slice %33 {offsets = [55, 14], sizes = [16, 6], strides = [1, 1]} : vector<76x20xf32> to vector<16x6xf32>
    %99 = vector.extract_strided_slice %33 {offsets = [56, 14], sizes = [16, 6], strides = [1, 1]} : vector<76x20xf32> to vector<16x6xf32>
    %100 = vector.extract_strided_slice %33 {offsets = [57, 14], sizes = [16, 6], strides = [1, 1]} : vector<76x20xf32> to vector<16x6xf32>
    %101 = vector.extract_strided_slice %33 {offsets = [58, 14], sizes = [16, 6], strides = [1, 1]} : vector<76x20xf32> to vector<16x6xf32>
    %102 = vector.extract_strided_slice %33 {offsets = [59, 14], sizes = [16, 6], strides = [1, 1]} : vector<76x20xf32> to vector<16x6xf32>
    %103 = vector.extract_strided_slice %33 {offsets = [60, 14], sizes = [16, 6], strides = [1, 1]} : vector<76x20xf32> to vector<16x6xf32>
    %104 = tpu.concatenate %81, %82, %83, %84, %85, %86, %87, %88, %89, %90, %91, %92, %93, %94, %95, %96 in 1 : vector<16x6xf32>, vector<16x6xf32>, vector<16x6xf32>, vector<16x6xf32>, vector<16x6xf32>, vector<16x6xf32>, vector<16x6xf32>, vector<16x6xf32>, vector<16x6xf32>, vector<16x6xf32>, vector<16x6xf32>, vector<16x6xf32>, vector<16x6xf32>, vector<16x6xf32>, vector<16x6xf32>, vector<16x6xf32> -> vector<16x96xf32>
    %105 = tpu.concatenate %97, %98, %99, %100, %101, %102, %103 in 1 : vector<16x6xf32>, vector<16x6xf32>, vector<16x6xf32>, vector<16x6xf32>, vector<16x6xf32>, vector<16x6xf32>, vector<16x6xf32> -> vector<16x42xf32>
    %106 = tpu.concatenate %104, %105 in 1 : vector<16x96xf32>, vector<16x42xf32> -> vector<16x138xf32>
    %107 = tpu.concatenate %80, %106 in 0 : vector<16x138xf32>, vector<16x138xf32> -> vector<32x138xf32>
    %cst_13 = arith.constant dense<0.000000e+00> : vector<32x8xf32>
    %108 = tpu.matmul %107, %8, %cst_13 {dimension_numbers = #tpu.dot_dimension_numbers<[1], [0], [0], [1], [0, 0, 1, 1], [], []>} : vector<32x138xf32>, vector<138x8xf32>, vector<32x8xf32> -> vector<32x8xf32>
    %109 = vector.broadcast %5 : vector<1x8xf32> to vector<32x8xf32>
    %110 = arith.addf %108, %109 : vector<32x8xf32>
    %cst_14 = arith.constant 0.000000e+00 : f32
    %111 = vector.broadcast %cst_14 : f32 to vector<32x8xf32>
    %112 = arith.maximumf %110, %111 : vector<32x8xf32>
    %113 = vector.extract_strided_slice %9 {offsets = [0, 20], sizes = [76, 8], strides = [1, 1]} : vector<76x28xf32> to vector<76x8xf32>
    %114 = vector.extract_strided_slice %113 {offsets = [10, 0], sizes = [16, 8], strides = [1, 1]} : vector<76x8xf32> to vector<16x8xf32>
    %115 = vector.extract_strided_slice %113 {offsets = [11, 0], sizes = [16, 8], strides = [1, 1]} : vector<76x8xf32> to vector<16x8xf32>
    %116 = arith.addf %114, %115 : vector<16x8xf32>
    %117 = vector.extract_strided_slice %113 {offsets = [12, 0], sizes = [16, 8], strides = [1, 1]} : vector<76x8xf32> to vector<16x8xf32>
    %118 = arith.addf %116, %117 : vector<16x8xf32>
    %cst_15 = arith.constant 0.333333343 : f32
    %119 = vector.broadcast %cst_15 : f32 to vector<16x8xf32>
    %120 = arith.mulf %118, %119 : vector<16x8xf32>
    %121 = vector.extract_strided_slice %113 {offsets = [48, 0], sizes = [16, 8], strides = [1, 1]} : vector<76x8xf32> to vector<16x8xf32>
    %122 = vector.extract_strided_slice %113 {offsets = [49, 0], sizes = [16, 8], strides = [1, 1]} : vector<76x8xf32> to vector<16x8xf32>
    %123 = arith.addf %121, %122 : vector<16x8xf32>
    %124 = vector.extract_strided_slice %113 {offsets = [50, 0], sizes = [16, 8], strides = [1, 1]} : vector<76x8xf32> to vector<16x8xf32>
    %125 = arith.addf %123, %124 : vector<16x8xf32>
    %cst_16 = arith.constant 0.333333343 : f32
    %126 = vector.broadcast %cst_16 : f32 to vector<16x8xf32>
    %127 = arith.mulf %125, %126 : vector<16x8xf32>
    %128 = tpu.concatenate %120, %127 in 0 : vector<16x8xf32>, vector<16x8xf32> -> vector<32x8xf32>
    %129 = vector.broadcast %6 : vector<1x8xf32> to vector<32x8xf32>
    %130 = arith.addf %128, %129 : vector<32x8xf32>
    %cst_17 = arith.constant 0.000000e+00 : f32
    %131 = vector.broadcast %cst_17 : f32 to vector<32x8xf32>
    %132 = arith.maximumf %130, %131 : vector<32x8xf32>
    %133 = tpu.concatenate %36, %54, %112, %132 in 1 : vector<32x8xf32>, vector<32x8xf32>, vector<32x8xf32>, vector<32x8xf32> -> vector<32x32xf32>
    %c0_18 = arith.constant 0 : index
    %c0_19 = arith.constant 0 : index
    %134 = vector.load %arg6[%c0_18, %c0_19] : memref<32x32xf32, #tpu.memory_space<vmem>>, vector<32x32xf32>
    tpu.vector_store %arg6[%c0_18, %c0_19], %133 {strides = array<i32>} : memref<32x32xf32, #tpu.memory_space<vmem>>, vector<32x32xf32>,
    return
  }
  func.func @transform_0(%arg0: i32) -> (i32, i32) {
    %c0_i32 = arith.constant 0 : i32
    %c0_i32_0 = arith.constant 0 : i32
    %c0_i32_1 = arith.constant 0 : i32
    return %c0_i32, %c0_i32_0 : i32, i32
  }
  func.func @transform_1(%arg0: i32) -> (i32, i32) {
    %c0_i32 = arith.constant 0 : i32
    %c0_i32_0 = arith.constant 0 : i32
    %c0_i32_1 = arith.constant 0 : i32
    return %c0_i32, %c0_i32_0 : i32, i32
  }
  func.func @transform_2(%arg0: i32) -> (i32, i32) {
    %c0_i32 = arith.constant 0 : i32
    %c0_i32_0 = arith.constant 0 : i32
    %c0_i32_1 = arith.constant 0 : i32
    return %c0_i32, %c0_i32_0 : i32, i32
  }
  func.func @transform_3(%arg0: i32) -> (i32, i32) {
    %c0_i32 = arith.constant 0 : i32
    %c0_i32_0 = arith.constant 0 : i32
    %c0_i32_1 = arith.constant 0 : i32
    return %c0_i32, %c0_i32_0 : i32, i32
  }
  func.func @transform_4(%arg0: i32) -> (i32, i32) {
    %c0_i32 = arith.constant 0 : i32
    %c0_i32_0 = arith.constant 0 : i32
    %c0_i32_1 = arith.constant 0 : i32
    return %c0_i32, %c0_i32_0 : i32, i32
  }
  func.func @transform_5(%arg0: i32) -> (i32, i32) {
    %c0_i32 = arith.constant 0 : i32
    %c0_i32_0 = arith.constant 0 : i32
    %c0_i32_1 = arith.constant 0 : i32
    return %c0_i32, %c0_i32_0 : i32, i32
  }
}

</mosaic_0001>

<bundles_post_ra>
// kernel: inception_forward.1
= control target key start
LH: loop header
LB: loop body
LE: loop exit
PB: predicated region body
PF: predicated region fallthrough
CT: control target
= control target key end

     0   :  { %vm86_vm0 = vcmask 1043456   ;;  %vm55_vm1 = vcmask 31744   ;;  %s3084_s0 = inlined_call_operand.vmem [shape: f32[76,4], index: 0, kind: input, shape index: {}]   ;;  %s3085_s1 = inlined_call_operand.vmem [shape: f32[4,28], index: 1, kind: input, shape index: {}]   ;;  %s3086_s2 = inlined_call_operand.vmem [shape: f32[4,20], index: 2, kind: input, shape index: {}]   ;;  %s3087_s3 = inlined_call_operand.vmem [shape: f32[30,8], index: 3, kind: input, shape index: {}]   ;;  %s3088_s4 = inlined_call_operand.vmem [shape: f32[138,8], index: 4, kind: input, shape index: {}]   ;;  %s3089_s5 = inlined_call_operand.hbm [shape: f32[32,32], index: 5, kind: output, shape index: {}]  }
   0x1   :  { %v31_v0 = vld [vmem:[%s3085_s1] sm:$0xf]  ;;  %v22_v2 = vld [vmem:[%s3084_s0 + $0x8] sm:$0xff]  ;;  %v23_v3 = vld [vmem:[%s3084_s0 + $0x10] sm:$0xff] }
   0x2   :  { %v21_v1 = vld [vmem:[%s3084_s0] sm:$0xff]  ;;  %1541 = vmatprep.subr.msk.mxu0 %vm86_vm0, %v31_v0  ;;  %v24_v4 = vld [vmem:[%s3084_s0 + $0x18] sm:$0xff] }
   0x3   :  { %1543 = vmatprep.mubr.msk.f32.mxu0 %vm55_vm1, %v21_v1  ;;  %1542 = vmatpush3.msk.msra.mxu0 %vm86_vm0, %v31_v0 }
   0x4   :  { %1544 = vmatmul.mubr.msk.f32.vlgmr.msra.gmra.mrb[0].mxu0 %vm55_vm1, %v22_v2 }
   0x5   :  { %1546 = vmatprep.mubr.msk.f32.mxu0 %vm55_vm1, %v23_v3 }
   0x6   :  { %10 = vsyncpa [#allocation3], 0  ;;  %v25_v5 = vld [vmem:[%s3084_s0 + $0x20] sm:$0xff]  ;;  %v26_v6 = vld [vmem:[%s3084_s0 + $0x28] sm:$0xff]  ;;  %v3090_v11 = vmov 0.0   ;;  %s1843_s14 = smov 114   ;;  %v205_v12 = vlaneseq }
   0x7   :  { %v27_v7 = vld [vmem:[%s3084_s0 + $0x30] sm:$0xff]  ;;  %v28_v8 = vld [vmem:[%s3084_s0 + $0x38] sm:$0xff]  ;;  %v29_v9 = vld [vmem:[%s3084_s0 + $0x40] sm:$0xff]  ;;  %1653 = vrot.lane.b32.xlu1 %v3090_v11, %s1843_s14  ;;  %vm374_vm4 = vcmask 1046528   ;;  %vm405_vm5 = vcmask 1045504   ;;  %vm363_vm6 = vcmask 1044480  }
   0x8   :  { %1547 = vmatmul.mubr.msk.f32.gmra.mrb[2].mxu0 %vm55_vm1, %v24_v4  ;;  %v30_v10 = vld [vmem:[%s3084_s0 + $0x48] sm:$0xf]  ;;  %v1943_v13 = vshrl.u32 %v205_v12, 7  ;;  %v32_v15 = vld [vmem:[%s3086_s2] sm:$0xf]  ;;  %s1844_s0 = smov 120  }
   0x9   :  { %1549 = vmatprep.mubr.msk.f32.mxu0 %vm55_vm1, %v25_v5  ;;  %v1999_v52 = vrot.slane %v3090_v11, 1  ;;  %vm693_vm7 = vcmask 1042432   ;;  %v2014_v60 = vrot.slane %v3090_v11, 2  ;;  %vm705_vm8 = vcmask 1041408   ;;  %s1845_s17 = smov 34   ;;  %s1846_s18 = smov 126  }
   0xa   :  { %3109 = vst [vmem:[#allocation5_spill] sm:$0xff] %v1943_v13  ;;  %v308_v14 = vsub.s32 0, %v1943_v13  ;;  %v207_v17 = vadd.s32 8, %v1943_v13  ;;  %v209_v18 = vadd.s32 24, %v1943_v13  ;;  %v2039_v4 = vrot.slane %v3090_v11, 5  ;;  %s1847_s19 = smov 4  }
   0xb   :  { %s1848_s20 = smov 10   ;;  %s1849_s21 = smov 16   ;;  %vm543_vm10 = vcmask 1040384   ;;  %vm1851_vm12 = vmmov 1   ;;  %vm443_vm14 = vcmask 48128   ;;  %vm447_vm15 = vcmask 97280  }
   0xc   :  { %1550 = vmatmul.mubr.msk.f32.gmra.mrb[4].mxu0 %vm55_vm1, %v26_v6  ;;  %v1949_v16 = vrot.slane %v32_v15, %v308_v14  ;;  %vm227_vm2 = vcmp.ge.s32.totalorder %v207_v17, 11  ;;  %vm239_vm3 = vcmp.lt.s32.totalorder %v209_v18, 27  ;;  %v2056_v14 = vrot.slane %v3090_v11, 4  ;;  %s1850_s22 = smov 22   ;;  %vm1577_vm13 = vmpackc.low %vm405_vm5, %vm1851_vm12  ;;  %s1853_s30 = smov 58  }
   0xd   :  { %1552 = vmatprep.mubr.msk.f32.mxu0 %vm55_vm1, %v27_v7  ;;  %s1854_s6 = smov 64   ;;  %s1855_s7 = smov 28  }
   0xe   :  { %s1856_s8 = smov 40   ;;  %s1857_s9 = smov 52  }
   0xf   :  { %s1860_s28 = smov 76  }
  0x10   :  { %1553 = vmatmul.mubr.msk.f32.gmra.mrb[6].mxu0 %vm55_vm1, %v28_v8 }
  0x11   :  { %1555 = vmatprep.mubr.msk.f32.mxu0 %vm55_vm1, %v29_v9 }
  0x14   :  { %1556 = vmatmul.mubr.msk.f32.gmra.mrb[8].mxu0 %vm55_vm1, %v30_v10  ;;  %vm455_vm1 = vcmask 195584  }
  0xd7   :  { %v1545_v19 = vpop.f32.mrb[0].mxu0 }
  0xd8   :  { %v311_v20 = vadd.f32 %v1545_v19, %v1949_v16  ;;  %v156_v21 = vpop.f32.mrb[1].mxu0  ;;  %v1344_v23 = vrot.slane %v1545_v19, 1  ;;  %v1355_v24 = vrot.slane %v1545_v19, 2 }
  0xd9   :  { %v2071_v21 = vrot.slane %v3090_v11, 6 }
  0xda   :  { %v321_v22 = vmax.f32 %v311_v20, 0.0 }
  0xdb   :  { %v1954_v25 = vpop.f32.mrb[2].mxu0 }
  0xdc   :  { %v1956_v26 = vsel %vm227_vm2, %v321_v22, 0.0  ;;  %v313_v27 = vadd.f32 %v1954_v25, %v1949_v16  ;;  %v1347_v28 = vrot.slane %v1954_v25, 1  ;;  %v1358_v29 = vrot.slane %v1954_v25, 2  ;;  %v166_v30 = vpop.f32.mrb[3].mxu0 }
  0xdd   :  { %v312_v31 = vadd.f32 %v1949_v16, %v166_v30  ;;  %v1345_v32 = vrot.slane %v166_v30, 1  ;;  %v1356_v33 = vrot.slane %v166_v30, 2  ;;  %382 = vrot.lane.b32.xlu1 %v1956_v26, %s1844_s0  ;;  %v1657_v34 = vpack.i.bf16 %v1956_v26, %v3090_v11 }
  0xde   :  { %v323_v35 = vmax.f32 %v313_v27, 0.0  ;;  %v695_v59 = vrot.slane %v1956_v26, 5  ;;  %v707_v6 = vrot.slane %v1956_v26, 6  ;;  %v391_v12 = vrot.slane %v1956_v26, 1 }
  0xdf   :  { %v1967_v36 = vmax.f32 %v312_v31, 0.0  ;;  %v1346_v37 = vsel %vm374_vm4, %v1344_v23, %v1345_v32  ;;  %v1348_v38 = vsel %vm374_vm4, %v1345_v32, %v1347_v28  ;;  %v1357_v39 = vsel %vm405_vm5, %v1355_v24, %v1356_v33  ;;  %1658 = vrot.lane.b32.xlu0 %v1657_v34, %s1843_s14  ;;  %v1551_v40 = vpop.f32.mrb[4].mxu0 }
  0xe0   :  { %v1976_v41 = vsel %vm239_vm3, %v323_v35, 0.0  ;;  %v1352_v42 = vadd.f32 %v1545_v19, %v1346_v37  ;;  %v1353_v43 = vadd.f32 %v1348_v38, %v166_v30  ;;  %v176_v44 = vpop.f32.mrb[5].mxu0  ;;  %v1359_v45 = vsel %vm405_vm5, %v1356_v33, %v1358_v29 }
  0xe1   :  { %824 = vrot.lane.b32.xlu1 %v1976_v41, %s1843_s14  ;;  %v1662_v46 = vpack.i.bf16 %v1967_v36, %v1956_v26  ;;  %v1986_v47 = vrot.slane %v1976_v41, 1  ;;  %v1989_v48 = vrot.slane %v1976_v41, 2  ;;  %v1996_v51 = vrot.slane %v1976_v41, 3 }
  0xe2   :  { %v1991_v49 = vadd.f32 %v1357_v39, %v1352_v42  ;;  %v1993_v50 = vadd.f32 %v1359_v45, %v1353_v43  ;;  %v2004_v53 = vrot.slane %v1976_v41, 4  ;;  %v392_v54 = vrot.slane %v1967_v36, 1 }
  0xe3   :  { %822 = vrot.lane.b32.xlu0 %v1967_v36, %s1843_s14  ;;  %v407_v55 = vrot.slane %v1967_v36, 2  ;;  %v430_v56 = vrot.slane %v1967_v36, 4  ;;  %v2009_v57 = vpop.f32.mrb[6].mxu0  ;;  %v365_v58 = vrot.slane %v1967_v36, 3  ;;  %v697_v1 = vrot.slane %v1967_v36, 5 }
  0xe4   :  { %v2016_v61 = vpop.f32.mrb[7].mxu0  ;;  %v2022_v62 = vsel %vm374_vm4, %v392_v54, %v1986_v47  ;;  %v3094_v3 = vrot.slane %v1976_v41, 5  ;;  %v709_v7 = vrot.slane %v1967_v36, 6  ;;  %v3093_v8 = vrot.slane %v1976_v41, 6 }
  0xe5   :  { %386 = vrot.lane.b32.xlu1 %v1976_v41, %s1844_s0  ;;  %v2026_v63 = vsel %vm405_vm5, %v407_v55, %v1989_v48  ;;  %v2030_v0 = vsel %vm86_vm0, %v430_v56, %v2004_v53  ;;  %v2035_v2 = vsel %vm363_vm6, %v365_v58, %v1996_v51  ;;  %v2044_v5 = vsel %vm693_vm7, %v695_v59, %v697_v1 }
  0xe6   :  { %3110 = vst [vmem:[#allocation6_spill] sm:$0xff] %v2035_v2  ;;  %v2052_v10 = vsel %vm693_vm7, %v697_v1, %v3094_v3  ;;  %v406_v15 = vrot.slane %v1956_v26, 2  ;;  %v2063_v19 = vsel %vm705_vm8, %v707_v6, %v709_v7  ;;  %v2068_v20 = vsel %vm705_vm8, %v709_v7, %v3093_v8 }
  0xe7   :  { %384 = vrot.lane.b32.xlu0 %v1967_v36, %s1844_s0  ;;  %v1557_v9 = vpop.f32.mrb[8].mxu0  ;;  %3111 = vst [vmem:[#allocation7_spill] sm:$0xff] %v2068_v20  ;;  %v2076_v23 = vsel %vm374_vm4, %v391_v12, %v392_v54  ;;  %v212_v27 = vadd.s32 48, %v1943_v13  ;;  %v429_v30 = vrot.slane %v1956_v26, 4  ;;  %v2087_v31 = vsel %vm374_vm4, %v1999_v52, %v391_v12 }
  0xe8   :  { %v196_v17 = vpop.f32.mrb[9].mxu0  ;;  %v2079_v24 = vsel %vm405_vm5, %v406_v15, %v407_v55  ;;  %v3092_v32 = vrot.slane %v1956_v26, 3  ;;  %v2092_v33 = vsel %vm693_vm7, %v2039_v4, %v695_v59  ;;  %v2102_v38 = vsel %vm405_vm5, %v2014_v60, %v406_v15 }
  0xe9   :  { %1663 = vrot.lane.b32.xlu1 %v1662_v46, %s1845_s17  ;;  %v2107_v39 = vsel %vm86_vm0, %v429_v30, %v430_v56  ;;  %v2120_v44 = vsel %vm86_vm0, %v2056_v14, %v429_v30  ;;  %v317_v45 = vadd.f32 %v2009_v57, %v1949_v16  ;;  %v2125_v46 = vrot.slane %v3090_v11, 7 }
  0xea   :  { %v2112_v40 = vsel %vm363_vm6, %v3092_v32, %v365_v58  ;;  %v1373_v55 = vrot.slane %v2009_v57, 1  ;;  %v1382_v56 = vrot.slane %v2009_v57, 2  ;;  %v316_v58 = vadd.f32 %v1949_v16, %v2016_v61 }
  0xeb   :  { %400 = vrot.lane.b32.xlu0 %v1986_v47, %s1846_s18  ;;  %3112 = vst [vmem:[#allocation8_spill] sm:$0xff] %v2112_v40  ;;  %vm272_vm9 = vcmp.ge.s32.totalorder %v212_v27, 49  ;;  %v1372_v59 = vrot.slane %v2016_v61, 1  ;;  %v1381_v1 = vrot.slane %v2016_v61, 2  ;;  %v2139_v7 = vsel %vm705_vm8, %v2071_v21, %v707_v6 }
  0xec   :  { %v326_v9 = vmax.f32 %v316_v58, 0.0  ;;  %v318_v15 = vadd.f32 %v1949_v16, %v196_v17  ;;  %v1375_v30 = vrot.slane %v196_v17, 1  ;;  %v1384_v54 = vrot.slane %v196_v17, 2 }
  0xed   :  { %415 = vrot.lane.b32.xlu1 %v1989_v48, %s1847_s19  ;;  %v1374_v22 = vsel %vm374_vm4, %v1372_v59, %v1373_v55  ;;  %v1383_v18 = vsel %vm405_vm5, %v1381_v1, %v1382_v56  ;;  %v718_v43 = vrot.slane %v1956_v26, 7  ;;  %v3095_v59 = vrot.slane %v1967_v36, 7 }
  0xee   :  { %v1379_v6 = vadd.f32 %v1374_v22, %v2016_v61  ;;  %v1376_v58 = vsel %vm374_vm4, %v1373_v55, %v1375_v30  ;;  %v2157_v16 = vsel %vm405_vm5, %v1382_v56, %v1384_v54  ;;  %v2162_v17 = vmax.f32 %v317_v45, 0.0 }
  0xef   :  { %424 = vrot.lane.b32.xlu0 %v1996_v51, %s1848_s20  ;;  %v2154_v12 = vadd.f32 %v2009_v57, %v1376_v58  ;;  %v2165_v1 = vsel %vm272_vm9, %v326_v9, 0.0  ;;  %v2173_v57 = vsel %vm543_vm10, %v2125_v46, %v718_v43  ;;  %v2178_v54 = vsel %vm543_vm10, %v718_v43, %v3095_v59 }
  0xf0   :  { %v2167_v61 = vadd.f32 %v1383_v18, %v1379_v6  ;;  %v2185_v18 = vrot.slane %v2162_v17, 3  ;;  %v214_v45 = vadd.s32 64, %v1943_v13  ;;  %v2189_v55 = vrot.slane %v2165_v1, 1 }
  0xf1   :  { %438 = vrot.lane.b32.xlu1 %v2004_v53, %s1849_s21  ;;  %v2192_v56 = vrot.slane %v2165_v1, 2  ;;  %v2195_v43 = vrot.slane %v2165_v1, 3  ;;  %v1354_v9 = vadd.f32 %v1954_v25, %v1347_v28  ;;  %v830_v30 = vsel %vm374_vm4, %v1986_v47, %v1999_v52 }
  0xf2   :  { %3113 = vst [vmem:[#allocation9_spill] sm:$0xff] %v2167_v61  ;;  %v2206_v6 = vrot.slane %v3090_v11, 3  ;;  %v2209_v58 = vrot.slane %v2165_v1, 5  ;;  %v328_v22 = vmax.f32 %v318_v15, 0.0  ;;  %v2212_v27 = vrot.slane %v2162_v17, 5 }
  0xf3   :  { %831 = vrot.lane.b32.xlu0 %v2022_v62, %s1844_s0  ;;  %3114 = vst [vmem:[#allocation10_spill] sm:$0xff] %v2195_v43  ;;  %v2217_v28 = vsel %vm374_vm4, %v1999_v52, %v2189_v55  ;;  %v2222_v42 = vsel %vm405_vm5, %v2014_v60, %v2192_v56  ;;  %v2237_v37 = vsel %vm363_vm6, %v2195_v43, %v2185_v18  ;;  %vm284_vm11 = vcmp.lt.s32.totalorder %v214_v45, 65 }
  0xf4   :  { %3115 = vst [vmem:[#allocation11_spill] sm:$0xff] %v2209_v58  ;;  %v2232_v11 = vsel %vm363_vm6, %v2206_v6, %v2195_v43  ;;  %v2240_v35 = vrot.slane %v2162_v17, 6  ;;  %v2247_v15 = vsel %vm693_vm7, %v2039_v4, %v2209_v58  ;;  %v1365_v47 = vadd.f32 %v1358_v29, %v1354_v9 }
  0xf5   :  { %839 = vrot.lane.b32.xlu1 %v2026_v63, %s1846_s18  ;;  %v838_v32 = vsel %vm405_vm5, %v1989_v48, %v2014_v60  ;;  %v2264_v34 = vrot.slane %v2165_v1, 6  ;;  %v2267_v25 = vrot.slane %v2165_v1, 7  ;;  %v2270_v29 = vsel %vm284_vm11, %v328_v22, 0.0 }
  0xf6   :  { %v3100_v9 = vrot.slane %v2162_v17, 7  ;;  %v1367_v45 = vmul.f32 0.33333334, %v1993_v50  ;;  %v2275_v48 = vrot.slane %v2162_v17, 2  ;;  %v1368_v22 = vmul.f32 0.33333334, %v1365_v47 }
  0xf7   :  { %855 = vrot.lane.b32.xlu0 %v2030_v0, %s1848_s20  ;;  %3116 = vst [vmem:[#allocation12_spill] sm:$0xff] %v2264_v34  ;;  %v2280_v8 = vsel %vm705_vm8, %v2264_v34, %v2240_v35  ;;  %v2285_v3 = vsel %vm705_vm8, %v2071_v21, %v2264_v34  ;;  %v846_v59 = vsel %vm363_vm6, %v1996_v51, %v2206_v6  ;;  %v495_v13 = vrot.slane %v2270_v29, 3 }
  0xf8   :  { %v3104_v50 = vrot.slane %v2270_v29, 5  ;;  %v1396_v34 = vrot.slane %v1367_v45, 2  ;;  %v2316_v51 = vsel %vm405_vm5, %v2192_v56, %v2275_v48  ;;  %v1398_v45 = vrot.slane %v1368_v22, 2 }
  0xf9   :  { %847 = vrot.lane.b32.xlu1 %v2035_v2, %s1847_s19  ;;  %v2311_v47 = vsel %vm363_vm6, %v2185_v18, %v495_v13  ;;  %v774_v61 = vrot.slane %v1976_v41, 7  ;;  %v1366_v43 = vmul.f32 0.33333334, %v1991_v49  ;;  %vm553_vm2 = vcmask 244736  }
  0xfa   :  { %vm792_vm3 = vcmask 293888   ;;  %vm807_vm9 = vcmask 539648   ;;  %vm810_vm11 = vcmask 588800  }
  0xfb   :  { %833 = vrot.lane.b32.xlu0 %v830_v30, %s1844_s0  ;;  %v2261_v30 = vsel %vm693_vm7, %v2209_v58, %v2212_v27  ;;  %v2307_v58 = vsel %vm363_vm6, %v495_v13, %v2206_v6  ;;  %v854_v13 = vsel %vm86_vm0, %v2004_v53, %v2056_v14  ;;  %v3117_v53 = vrot.slane %v1967_v36, 7 }
  0xfc   :  { %v3119_v36 = vrot.slane %v1976_v41, 6 }
  0xfd   :  { %863 = vrot.lane.b32.xlu1 %v2052_v10, %s1849_s21  ;;  %v2346_v22 = vsel %vm543_vm10, %v3117_v53, %v774_v61 }
  0xfe   :  { %v870_v61 = vsel %vm705_vm8, %v3119_v36, %v2071_v21 }
  0xff   :  { %841 = vrot.lane.b32.xlu0 %v838_v32, %s1846_s18  ;;  %v2295_v32 = vsel %vm543_vm10, %v2267_v25, %v3100_v9  ;;  %v3118_v9 = vrot.slane %v1976_v41, 5  ;;  %v35_v41 = vld [vmem:[%s3087_s3 + $0x10] sm:$0xff] }
 0x101   :  { %871 = vrot.lane.b32.xlu1 %v2068_v20, %s1850_s22  ;;  %v2336_v20 = vadd.f32 %v2157_v16, %v2154_v12  ;;  %v862_v49 = vsel %vm693_vm7, %v3118_v9, %v2039_v4  ;;  %v34_v9 = vld [vmem:[%s3087_s3 + $0x8] sm:$0xff] }
 0x103   :  { %849 = vrot.lane.b32.xlu0 %v846_v59, %s1847_s19  ;;  %v2324_v59 = vsel %vm693_vm7, %v3104_v50, %v2039_v4  ;;  %v2339_v50 = vsel %vm405_vm5, %v1396_v34, %v1398_v45  ;;  %v36_v45 = vld [vmem:[%s3087_s3 + $0x18] sm:$0x3f] }
 0x104   :  { %v1576_v53 = vpack.c.bf16 %v36_v45, %v35_v41  ;;  %v3132_v45 = vpack.i.bf16 %v2217_v28, %v1999_v52 }
 0x105   :  { %396 = vrot.lane.b32.xlu1 %v2076_v23, %s1846_s18 }
 0x107   :  { %857 = vrot.lane.b32.xlu0 %v854_v13, %s1848_s20  ;;  %v1395_v13 = vrot.slane %v1366_v43, 2  ;;  %v33_v43 = vld [vmem:[%s3087_s3] sm:$0xff]  ;;  %s1852_s3 = smov 46  }
 0x109   :  { %411 = vrot.lane.b32.xlu1 %v2079_v24, %s1847_s19  ;;  %v2356_v16 = vsel %vm405_vm5, %v1395_v13, %v1396_v34  ;;  %v1572_v34 = vpack.c.bf16 %v34_v9, %v33_v43  ;;  %v3120_v13 = vpack.i.bf16 %v2076_v23, %v2087_v31  ;;  %v3122_v31 = vpack.i.bf16 %v2044_v5, %v2092_v33 }
 0x10a   :  { %v3124_v43 = vpack.i.bf16 %v2079_v24, %v2102_v38  ;;  %v3125_v33 = vpack.i.bf16 %v2030_v0, %v2107_v39  ;;  %v3126_v9 = vpack.i.bf16 %v2107_v39, %v2120_v44  ;;  %v2449_v38 = vrot.slane %v2162_v17, 4  ;;  %v2469_v44 = vpop.permute.xlu1 %1653 }
 0x10b   :  { %865 = vrot.lane.b32.xlu0 %v862_v49, %s1849_s21  ;;  %1573 = vmatprep.subr.bf16.mxu1 %v1572_v34  ;;  %v3121_v49 = vrot.slane %v1956_v26, 3  ;;  %v3123_v26 = vpack.i.bf16 %v2026_v63, %v2079_v24  ;;  %v3128_v24 = vpack.i.bf16 %v2063_v19, %v2139_v7 }
 0x10c   :  { %1575 = vmatpush3.bf16.msra.mxu1 %v1572_v34 }
 0x10d   :  { %422 = vrot.lane.b32.xlu1 %v2035_v2, %s1848_s20  ;;  %v678_v36 = vsel %vm363_vm6, %v2206_v6, %v3121_v49  ;;  %1578 = vmatprep.subr.msk.bf16.mxu1 %vm1577_vm13, %v1576_v53  ;;  %vm801_vm6 = vcmask 441344  }
 0x10f   :  { %873 = vrot.lane.b32.xlu0 %v870_v61, %s1850_s22  ;;  %v1677_v61 = vpack.i.bf16 %v2112_v40, %v678_v36  ;;  %v3134_v36 = vpack.i.bf16 %v2232_v11, %v2206_v6 }
 0x110   :  { %1581 = vmatpush3.bf16.msk.msra.mxu1 %vm1577_vm13, %v1576_v53  ;;  %v2496_v53 = vrot.slane %v2165_v1, 4  ;;  %vm813_vm13 = vcmask 637952  }
 0x111   :  { %434 = vrot.lane.b32.xlu1 %v2107_v39, %s1849_s21 }
 0x112   :  { %v944_v52 = vsel %vm86_vm0, %v2056_v14, %v2496_v53 }
 0x113   :  { %398 = vrot.lane.b32.xlu0 %v2022_v62, %s1846_s18  ;;  %v1752_v11 = vpack.i.bf16 %v944_v52, %v2056_v14 }
 0x115   :  { %1668 = vrot.lane.b32.xlu1 %v3120_v13, %s1844_s0 }
 0x117   :  { %413 = vrot.lane.b32.xlu0 %v2026_v63, %s1847_s19  ;;  %v3127_v63 = vpack.i.bf16 %v2052_v10, %v2044_v5  ;;  %v3130_v5 = vpack.i.bf16 %v2022_v62, %v2076_v23  ;;  %v1712_v10 = vpack.i.bf16 %v2035_v2, %v2112_v40  ;;  %v2460_v62 = vrot.slane %v2162_v17, 1 }
 0x118   :  { %v3131_v23 = vmov 0.0  }
 0x119   :  { %1678 = vrot.lane.b32.xlu1 %v1677_v61, %s1847_s19  ;;  %v1732_v39 = vpack.i.bf16 %v3131_v23, %v2189_v55  ;;  %v1727_v7 = vpack.i.bf16 %v2165_v1, %v3131_v23 }
 0x11b   :  { %420 = vrot.lane.b32.xlu0 %v2112_v40, %s1848_s20 }
 0x11d   :  { %1688 = vrot.lane.b32.xlu1 %v3122_v31, %s1849_s21  ;;  %v3135_v31 = vpack.i.bf16 %v2247_v15, %v2039_v4  ;;  %v3136_v4 = vpack.i.bf16 %v2285_v3, %v2071_v21 }
 0x11f   :  { %436 = vrot.lane.b32.xlu0 %v2030_v0, %s1849_s21  ;;  %v3129_v0 = vpack.i.bf16 %v2178_v54, %v2173_v57 }
 0x121   :  { %1708 = vrot.lane.b32.xlu1 %v3123_v26, %s1852_s3 }
 0x123   :  { %1673 = vrot.lane.b32.xlu0 %v3124_v43, %s1846_s18  ;;  %v984_v43 = vsel %vm543_vm10, %v2125_v46, %v2267_v25 }
 0x124   :  { %v1767_v15 = vpack.i.bf16 %v984_v43, %v2125_v46 }
 0x125   :  { %1718 = vrot.lane.b32.xlu1 %v3125_v33, %s1853_s30 }
 0x127   :  { %1683 = vrot.lane.b32.xlu0 %v3126_v9, %s1848_s20 }
 0x129   :  { %1723 = vrot.lane.b32.xlu1 %v3127_v63, %s1854_s6 }
 0x12b   :  { %1693 = vrot.lane.b32.xlu0 %v3128_v24, %s1850_s22 }
 0x12d   :  { %1119 = vrot.lane.b32.xlu1 %v2162_v17, %s1843_s14 }
 0x12f   :  { %1698 = vrot.lane.b32.xlu0 %v3129_v0, %s1855_s7 }
 0x131   :  { %1000 = vrot.lane.b32.xlu1 %v2162_v17, %s1845_s17 }
 0x133   :  { %1703 = vrot.lane.b32.xlu0 %v3130_v5, %s1856_s8  ;;  %v378_v5 = vrot.slane %v2270_v29, 1 }
 0x135   :  { %1134 = vrot.lane.b32.xlu1 %v2275_v48, %s1846_s18 }
 0x137   :  { %1713 = vrot.lane.b32.xlu0 %v1712_v10, %s1857_s9  ;;  %v481_v10 = vrot.slane %v2270_v29, 2 }
 0x139   :  { %1146 = vrot.lane.b32.xlu1 %v2185_v18, %s1847_s19  ;;  %v2483_v18 = vsel %vm374_vm4, %v2189_v55, %v2460_v62 }
 0x13b   :  { %464 = vrot.lane.b32.xlu0 %v2162_v17, %s1844_s0 }
 0x13d   :  { %1157 = vrot.lane.b32.xlu1 %v2449_v38, %s1848_s20 }
 0x13f   :  { %904 = vrot.lane.b32.xlu0 %v2165_v1, %s1843_s14 }
 0x141   :  { %1168 = vrot.lane.b32.xlu1 %v2212_v27, %s1849_s21 }
 0x143   :  { %1179 = vrot.lane.b32.xlu0 %v2240_v35, %s1850_s22 }
 0x145   :  { %473 = vrot.lane.b32.xlu1 %v2460_v62, %s1846_s18 }
 0x147   :  { %462 = vrot.lane.b32.xlu0 %v2165_v1, %s1844_s0 }
 0x149   :  { %1733 = vrot.lane.b32.xlu1 %v1732_v39, %s1844_s0  ;;  %v2575_v39 = vsel %vm374_vm4, %v2460_v62, %v378_v5 }
 0x14a   :  { %3137 = vst [vmem:[#allocation13_spill] sm:$0xff] %v2575_v39 }
 0x14b   :  { %1728 = vrot.lane.b32.xlu0 %v1727_v7, %s1845_s17 }
 0x14d   :  { %469 = vrot.lane.b32.xlu1 %v2189_v55, %s1846_s18  ;;  %v3133_v55 = vpack.i.bf16 %v2222_v42, %v2014_v60  ;;  %v2520_v60 = vsel %vm86_vm0, %v2496_v53, %v2449_v38 }
 0x14f   :  { %v2476_v57 = vpop.permute.xlu1 %382  ;;  %927 = vrot.lane.b32.xlu0 %v2192_v56, %s1846_s18 }
 0x151   :  { %v2485_v34 = vpop.permute.xlu0 %1658  ;;  %1125 = vrot.lane.b32.xlu1 %v2483_v18, %s1844_s0 }
 0x153   :  { %v2489_v41 = vpop.permute.xlu1 %824  ;;  %1738 = vrot.lane.b32.xlu0 %v3132_v45, %s1844_s0 }
 0x155   :  { %v2498_v13 = vpop.permute.xlu0 %822  ;;  %1743 = vrot.lane.b32.xlu1 %v3133_v55, %s1846_s18  ;;  %v2587_v55 = vsel %vm405_vm5, %v2275_v48, %v481_v10  ;;  %vm798_vm5 = vcmask 392192  }
 0x157   :  { %v2504_v49 = vpop.permute.xlu1 %386  ;;  %1748 = vrot.lane.b32.xlu0 %v3134_v36, %s1847_s19  ;;  %v509_v36 = vrot.slane %v2270_v29, 4 }
 0x159   :  { %v2513_v1 = vpop.permute.xlu0 %384  ;;  %938 = vrot.lane.b32.xlu1 %v2237_v37, %s1847_s19 }
 0x15b   :  { %v2522_v42 = vpop.permute.xlu1 %1663  ;;  %949 = vrot.lane.b32.xlu0 %v2520_v60, %s1848_s20 }
 0x15d   :  { %v401_v6 = vpop.permute.xlu0 %400  ;;  %1753 = vrot.lane.b32.xlu1 %v1752_v11, %s1848_s20  ;;  %v1156_v11 = vsel %vm86_vm0, %v509_v36, %v2056_v14 }
 0x15f   :  { %v416_v61 = vpop.permute.xlu1 %415  ;;  %1758 = vrot.lane.b32.xlu0 %v3135_v31, %s1849_s21 }
 0x161   :  { %v2532_v26 = vpop.permute.xlu0 %424  ;;  %963 = vrot.lane.b32.xlu1 %v2261_v30, %s1849_s21 }
 0x163   :  { %v2539_v33 = vpop.permute.xlu1 %438  ;;  %977 = vrot.lane.b32.xlu0 %v2280_v8, %s1850_s22 }
 0x165   :  { %v2543_v9 = vpop.permute.xlu0 %831  ;;  %1763 = vrot.lane.b32.xlu1 %v3136_v4, %s1850_s22 }
 0x167   :  { %v2550_v63 = vpop.permute.xlu1 %839  ;;  %1768 = vrot.lane.b32.xlu0 %v1767_v15, %s1855_s7  ;;  %v2606_v15 = vsel %vm86_vm0, %v2449_v38, %v509_v36  ;;  %vm451_vm0 = vcmask 146432  }
 0x169   :  { %v2553_v24 = vpop.permute.xlu0 %855  ;;  %991 = vrot.lane.b32.xlu1 %v2295_v32, %s1855_s7 }
 0x16b   :  { %v2557_v0 = vpop.permute.xlu1 %847  ;;  %471 = vrot.lane.b32.xlu0 %v2483_v18, %s1846_s18 }
 0x16d   :  { %v2562_v3 = vpop.permute.xlu0 %833  ;;  %1129 = vrot.lane.b32.xlu1 %v378_v5, %s1844_s0 }
 0x16f   :  { %v2565_v46 = vpop.permute.xlu1 %863  ;;  %1121 = vrot.lane.b32.xlu0 %v2270_v29, %s1843_s14  ;;  %s1859_s14 = smov 70  }
 0x171   :  { %v2570_v23 = vpop.permute.xlu0 %841  ;;  %1138 = vrot.lane.b32.xlu1 %v481_v10, %s1846_s18 }
 0x173   :  { %v2577_v7 = vpop.permute.xlu1 %871  ;;  %1127 = vrot.lane.b32.xlu0 %v2575_v39, %s1844_s0 }
 0x175   :  { %v2581_v45 = vpop.permute.xlu0 %849  ;;  %1150 = vrot.lane.b32.xlu1 %v2307_v58, %s1847_s19  ;;  %v1052_v58 = vrot.slane %v2270_v29, 6 }
 0x177   :  { %v397_v52 = vpop.permute.xlu1 %396  ;;  %1136 = vrot.lane.b32.xlu0 %v2587_v55, %s1846_s18  ;;  %v2612_v5 = vsel %vm705_vm8, %v2240_v35, %v1052_v58  ;;  %v446_v35 = vsel %vm443_vm14, %v2504_v49, %v401_v6  ;;  %v1178_v12 = vsel %vm705_vm8, %v1052_v58, %v2071_v21  ;;  %v1858_v49 = vmov 0.0|0.0  }
 0x178   :  { %1582 = vmatprep.subr.bf16.mxu0 %v1858_v49  ;;  %1610 = vmatprep.subr.bf16.mxu1 %v1858_v49 }
 0x179   :  { %v2594_v31 = vpop.permute.xlu0 %857  ;;  %1161 = vrot.lane.b32.xlu1 %v1156_v11, %s1848_s20  ;;  %v3138_v11 = vrot.slane %v2270_v29, 5 }
 0x17b   :  { %v412_v43 = vpop.permute.xlu1 %411  ;;  %1148 = vrot.lane.b32.xlu0 %v2311_v47, %s1847_s19 }
 0x17d   :  { %v2600_v4 = vpop.permute.xlu0 %865  ;;  %1172 = vrot.lane.b32.xlu1 %v2324_v59, %s1849_s21  ;;  %v2622_v59 = vsel %vm693_vm7, %v2212_v27, %v3138_v11  ;;  %v1777_v27 = vpack.i.bf16 %v2483_v18, %v2217_v28  ;;  %v450_v11 = vsel %vm447_vm15, %v446_v35, %v416_v61  ;;  %v444_v28 = vsel %vm443_vm14, %v2476_v57, %v397_v52  ;;  %v38_v57 = vld [vmem:[%s3088_s4 + $0x8] sm:$0xff] }
 0x17e   :  { %v454_v21 = vsel %vm451_vm0, %v450_v11, %v2532_v26  ;;  %v37_v26 = vld [vmem:[%s3088_s4] sm:$0xff]  ;;  %v39_v11 = vld [vmem:[%s3088_s4 + $0x10] sm:$0xff]  ;;  %vm3108_vm7 = vcmask 490496  }
 0x17f   :  { %v423_v14 = vpop.permute.xlu1 %422  ;;  %1159 = vrot.lane.b32.xlu0 %v2606_v15, %s1848_s20  ;;  %v458_v52 = vsel %vm455_vm1, %v454_v21, %v2539_v33 }
 0x181   :  { %v2614_v10 = vpop.permute.xlu0 %873  ;;  %1181 = vrot.lane.b32.xlu1 %v2612_v5, %s1850_s22 }
 0x183   :  { %v435_v38 = vpop.permute.xlu1 %434  ;;  %1170 = vrot.lane.b32.xlu0 %v2622_v59, %s1849_s21 }
 0x185   :  { %v399_v36 = vpop.permute.xlu0 %398  ;;  %485 = vrot.lane.b32.xlu1 %v2316_v51, %s1847_s19 }
 0x186   :  { %v445_v6 = vsel %vm443_vm14, %v2513_v1, %v399_v36  ;;  %v1583_v36 = vpack.c.bf16 %v38_v57, %v37_v26 }
 0x187   :  { %v2632_v39 = vpop.permute.xlu1 %1668  ;;  %1183 = vrot.lane.b32.xlu0 %v1178_v12, %s1850_s22  ;;  %v448_v12 = vsel %vm447_vm15, %v444_v28, %v412_v43  ;;  %v3139_v43 = vld [vmem:[#allocation7_spill] sm:$0xff]  ;;  %v40_v28 = vld [vmem:[%s3088_s4 + $0x18] sm:$0xff] }
 0x188   :  { %1584 = vmatpush1.bf16.msra.mxu0 %v1583_v36 }
 0x189   :  { %v414_v2 = vpop.permute.xlu0 %413  ;;  %1778 = vrot.lane.b32.xlu1 %v1777_v27, %s1856_s8  ;;  %1585 = vmatprep.subr.bf16.mxu0 %v1858_v49 }
 0x18a   :  { %v449_v58 = vsel %vm447_vm15, %v445_v6, %v414_v2  ;;  %v3140_v2 = vpack.i.bf16 %v3139_v43, %v2063_v19  ;;  %v1586_v19 = vpack.c.bf16 %v40_v28, %v39_v11  ;;  %v538_v6 = vrot.slane %v458_v52, 1  ;;  %v3142_v28 = vld [vmem:[#allocation10_spill] sm:$0xff] }
 0x18b   :  { %v2639_v40 = vpop.permute.xlu1 %1678  ;;  %483 = vrot.lane.b32.xlu0 %v2192_v56, %s1847_s19  ;;  %v453_v33 = vsel %vm451_vm0, %v449_v58, %v423_v14  ;;  %v42_v58 = vld [vmem:[%s3088_s4 + $0x28] sm:$0xff] }
 0x18c   :  { %1587 = vmatpush1.bf16.msra.mxu0 %v1586_v19 }
 0x18d   :  { %v421_v61 = vpop.permute.xlu0 %420  ;;  %499 = vrot.lane.b32.xlu1 %v2237_v37, %s1848_s20  ;;  %1588 = vmatprep.subr.bf16.mxu0 %v1858_v49 }
 0x18e   :  { %v452_v35 = vsel %vm451_vm0, %v448_v12, %v421_v61  ;;  %v3141_v12 = vpack.i.bf16 %v2316_v51, %v2192_v56  ;;  %v1671_v61 = vunpack.i.h.bf16 %v2632_v39  ;;  %v1661_v56 = vunpack.i.h.bf16 %v2485_v34  ;;  %v41_v51 = vld [vmem:[%s3088_s4 + $0x20] sm:$0xff] }
 0x18f   :  { %v2664_v1 = vpop.permute.xlu1 %1688  ;;  %1773 = vrot.lane.b32.xlu0 %v3140_v2, %s1859_s14  ;;  %v456_v27 = vsel %vm455_vm1, %v452_v35, %v435_v38  ;;  %v1670_v35 = vunpack.i.l.bf16 %v2632_v39  ;;  %v1660_v39 = vunpack.i.l.bf16 %v2485_v34  ;;  %v1589_v2 = vpack.c.bf16 %v42_v58, %v41_v51 }
 0x190   :  { %v535_v26 = vrot.slane %v456_v27, 1  ;;  %v783_v34 = vsel %vm443_vm14, %v1661_v56, %v1671_v61  ;;  %v43_v61 = vld [vmem:[%s3088_s4 + $0x30] sm:$0xff] }
 0x191   :  { %v437_v21 = vpop.permute.xlu0 %436  ;;  %1788 = vrot.lane.b32.xlu1 %v3141_v12, %s1852_s3  ;;  %v1681_v12 = vunpack.i.h.bf16 %v2639_v40  ;;  %1590 = vmatpush1.bf16.msra.mxu0 %v1589_v2 }
 0x192   :  { %v457_v38 = vsel %vm455_vm1, %v453_v33, %v437_v21  ;;  %v1792_v33 = vpack.i.bf16 %v2237_v37, %v3142_v28  ;;  %v782_v21 = vsel %vm443_vm14, %v1660_v39, %v1670_v35  ;;  %v44_v35 = vld [vmem:[%s3088_s4 + $0x38] sm:$0xff]  ;;  %1591 = vmatprep.subr.bf16.mxu0 %v1858_v49 }
 0x193   :  { %v536_v57 = vrot.slane %v457_v38, 1  ;;  %v2686_v14 = vpop.permute.xlu1 %1708  ;;  %1009 = vrot.lane.b32.xlu0 %v2460_v62, %s1856_s8  ;;  %v1680_v38 = vunpack.i.l.bf16 %v2639_v40  ;;  %v1592_v51 = vpack.c.bf16 %v44_v35, %v43_v61 }
 0x195   :  { %v1674_v52 = vpop.permute.xlu0 %1673  ;;  %513 = vrot.lane.b32.xlu1 %v2520_v60, %s1849_s21  ;;  %v537_v43 = vsel %vm374_vm4, %v535_v26, %v536_v57  ;;  %v539_v62 = vsel %vm374_vm4, %v536_v57, %v538_v6  ;;  %1593 = vmatpush1.bf16.msra.mxu0 %v1592_v51  ;;  %vm795_vm4 = vcmask 343040  }
 0x196   :  { %v1676_v27 = vunpack.i.h.bf16 %v1674_v52  ;;  %v1675_v11 = vunpack.i.l.bf16 %v1674_v52  ;;  %1566 = vmatprep.mubr.msk.f32.mxu1 %vm553_vm2, %v537_v43  ;;  %v1691_v52 = vunpack.i.h.bf16 %v2664_v1  ;;  %v1690_v43 = vunpack.i.l.bf16 %v2664_v1  ;;  %1594 = vmatprep.subr.bf16.mxu0 %v1858_v49 }
 0x197   :  { %v2710_v6 = vpop.permute.xlu1 %1718  ;;  %1567 = vmatmul.mubr.msk.f32.vlgmr.msra.gmra.mrb[0].mxu1 %vm553_vm2, %v539_v62  ;;  %497 = vrot.lane.b32.xlu0 %v3142_v28, %s1848_s20  ;;  %v3143_v62 = vpack.i.bf16 %v2346_v22, %v2178_v54  ;;  %v3144_v1 = vpack.i.bf16 %v2295_v32, %v2267_v25  ;;  %v45_v54 = vld [vmem:[%s3088_s4 + $0x40] sm:$0xff]  ;;  %v46_v22 = vld [vmem:[%s3088_s4 + $0x48] sm:$0xff] }
 0x198   :  { %v785_v26 = vsel %vm447_vm15, %v783_v34, %v1676_v27  ;;  %v784_v37 = vsel %vm447_vm15, %v782_v21, %v1675_v11  ;;  %1619 = vmatpush1.bf16.msra.mxu1 %v1583_v36 }
 0x199   :  { %v1684_v40 = vpop.permute.xlu0 %1683  ;;  %v786_v57 = vsel %vm451_vm0, %v784_v37, %v1680_v38  ;;  %v787_v56 = vsel %vm451_vm0, %v785_v26, %v1681_v12  ;;  %1793 = vrot.lane.b32.xlu1 %v1792_v33, %s1857_s9  ;;  %1611 = vmatprep.subr.bf16.mxu1 %v1858_v49  ;;  %v1595_v12 = vpack.c.bf16 %v46_v22, %v45_v54  ;;  %v47_v26 = vld [vmem:[%s3088_s4 + $0x50] sm:$0xff]  ;;  %v48_v37 = vld [vmem:[%s3088_s4 + $0x58] sm:$0xff] }
 0x19a   :  { %v1686_v58 = vunpack.i.h.bf16 %v1684_v40  ;;  %v1685_v39 = vunpack.i.l.bf16 %v1684_v40  ;;  %v3145_v54 = vld [vmem:[#allocation11_spill] sm:$0xff] }
 0x19b   :  { %v2730_v36 = vpop.permute.xlu1 %1723  ;;  %1783 = vrot.lane.b32.xlu0 %v3143_v62, %s1860_s28  ;;  %1596 = vmatpush1.bf16.msra.mxu0 %v1595_v12  ;;  %v1802_v22 = vpack.i.bf16 %v2261_v30, %v3145_v54 }
 0x19c   :  { %v788_v27 = vsel %vm455_vm1, %v786_v57, %v1685_v39  ;;  %v789_v11 = vsel %vm455_vm1, %v787_v56, %v1686_v58  ;;  %1620 = vmatpush1.bf16.msra.mxu1 %v1586_v19  ;;  %1597 = vmatprep.subr.bf16.mxu0 %v1858_v49  ;;  %v1797_v56 = vpack.i.bf16 %v2520_v60, %v2496_v53  ;;  %v1711_v60 = vunpack.i.h.bf16 %v2686_v14 }
 0x19d   :  { %v1694_v28 = vpop.permute.xlu0 %1693  ;;  %v790_v33 = vsel %vm553_vm2, %v788_v27, %v1690_v43  ;;  %v791_v34 = vsel %vm553_vm2, %v789_v11, %v1691_v52  ;;  %1813 = vrot.lane.b32.xlu1 %v3144_v1, %s1860_s28  ;;  %1612 = vmatprep.subr.bf16.mxu1 %v1858_v49  ;;  %v1666_v52 = vunpack.i.h.bf16 %v2522_v42  ;;  %v1665_v43 = vunpack.i.l.bf16 %v2522_v42 }
 0x19e   :  { %v1696_v19 = vunpack.i.h.bf16 %v1694_v28  ;;  %v1695_v21 = vunpack.i.l.bf16 %v1694_v28 }
 0x19f   :  { %v2752_v38 = vpop.permute.xlu1 %1119  ;;  %1018 = vrot.lane.b32.xlu0 %v2275_v48, %s1852_s3  ;;  %v2766_v48 = vpack.c.bf16 %v48_v37, %v47_v26  ;;  %v53_v37 = vld [vmem:[%s3088_s4 + $0x80] sm:$0xff] }
 0x1a0   :  { %v793_v25 = vsel %vm792_vm3, %v790_v33, %v1695_v21  ;;  %v794_v32 = vsel %vm792_vm3, %v791_v34, %v1696_v19  ;;  %1621 = vmatpush1.bf16.msra.mxu1 %v1589_v2  ;;  %v49_v2 = vld [vmem:[%s3088_s4 + $0x60] sm:$0xff] }
 0x1a1   :  { %v1699_v61 = vpop.permute.xlu0 %1698  ;;  %487 = vrot.lane.b32.xlu1 %v2587_v55, %s1847_s19  ;;  %1613 = vmatprep.subr.bf16.mxu1 %v1858_v49  ;;  %v50_v55 = vld [vmem:[%s3088_s4 + $0x68] sm:$0xff] }
 0x1a2   :  { %v1701_v35 = vunpack.i.h.bf16 %v1699_v61  ;;  %v1700_v40 = vunpack.i.l.bf16 %v1699_v61  ;;  %1599 = vmatpush1.bf16.msra.mxu0 %v2766_v48  ;;  %v1601_v27 = vpack.c.bf16 %v50_v55, %v49_v2  ;;  %v54_v61 = vld [vmem:[%s3088_s4 + $0x88] sm:$0x3]  ;;  %v1721_v2 = vunpack.i.h.bf16 %v2710_v6 }
 0x1a3   :  { %v2770_v57 = vpop.permute.xlu1 %1000  ;;  %511 = vrot.lane.b32.xlu0 %v2496_v53, %s1849_s21  ;;  %1600 = vmatprep.subr.bf16.mxu0 %v1858_v49  ;;  %v1720_v55 = vunpack.i.l.bf16 %v2710_v6 }
 0x1a4   :  { %v796_v58 = vsel %vm795_vm4, %v793_v25, %v1700_v40  ;;  %v797_v39 = vsel %vm795_vm4, %v794_v32, %v1701_v35  ;;  %1622 = vmatpush1.bf16.msra.mxu1 %v1592_v51  ;;  %v1710_v51 = vunpack.i.l.bf16 %v2686_v14  ;;  %v51_v25 = vld [vmem:[%s3088_s4 + $0x70] sm:$0xff]  ;;  %v3146_v35 = vld [vmem:[#allocation12_spill] sm:$0xff] }
 0x1a5   :  { %v1704_v62 = vpop.permute.xlu0 %1703  ;;  %501 = vrot.lane.b32.xlu1 %v2311_v47, %s1848_s20  ;;  %1614 = vmatprep.subr.bf16.mxu1 %v1858_v49  ;;  %v799_v42 = vsel %vm798_vm5, %v796_v58, %v1665_v43  ;;  %v800_v28 = vsel %vm798_vm5, %v797_v39, %v1666_v52  ;;  %v1807_v40 = vpack.i.bf16 %v2280_v8, %v3146_v35  ;;  %v1726_v58 = vunpack.i.h.bf16 %v2730_v36 }
 0x1a6   :  { %v1706_v11 = vunpack.i.h.bf16 %v1704_v62  ;;  %v1705_v53 = vunpack.i.l.bf16 %v1704_v62  ;;  %1602 = vmatpush1.bf16.msra.mxu0 %v1601_v27  ;;  %v1725_v39 = vunpack.i.l.bf16 %v2730_v36 }
 0x1a7   :  { %v2795_v33 = vpop.permute.xlu1 %1134  ;;  %1798 = vrot.lane.b32.xlu0 %v1797_v56, %s1853_s30  ;;  %1603 = vmatprep.subr.bf16.mxu0 %v1858_v49 }
 0x1a8   :  { %v802_v34 = vsel %vm801_vm6, %v799_v42, %v1705_v53  ;;  %v803_v1 = vsel %vm801_vm6, %v800_v28, %v1706_v11  ;;  %1623 = vmatpush1.bf16.msra.mxu1 %v1595_v12  ;;  %v52_v12 = vld [vmem:[%s3088_s4 + $0x78] sm:$0xff]  ;;  %v1607_v11 = vpack.c.bf16 %v54_v61, %v53_v37  ;;  %v1063_v42 = vrot.slane %v2270_v29, 7  ;;  %s1861_s4 = smov 96  }
 0x1a9   :  { %v1714_v19 = vpop.permute.xlu0 %1713  ;;  %v805_v14 = vsel %vm3108_vm7, %v802_v34, %v1710_v51  ;;  %v806_v21 = vsel %vm3108_vm7, %v803_v1, %v1711_v60  ;;  %515 = vrot.lane.b32.xlu1 %v2606_v15, %s1849_s21  ;;  %v1604_v26 = vpack.c.bf16 %v52_v12, %v51_v25  ;;  %1615 = vmatprep.subr.bf16.mxu1 %v1858_v49  ;;  %vm2838_vm7 = vmpackc.low %vm705_vm8, %vm1851_vm12  ;;  %v3149_v29 = vrot.slane %v2162_v17, 7 }
 0x1aa   :  { %v1716_v30 = vunpack.i.h.bf16 %v1714_v19  ;;  %v1715_v32 = vunpack.i.l.bf16 %v1714_v19  ;;  %v1656_v12 = vunpack.i.h.bf16 %v2469_v44  ;;  %vm3151_vm12 = vcmask 490496  }
 0x1ab   :  { %v2824_v56 = vpop.permute.xlu1 %1146  ;;  %1803 = vrot.lane.b32.xlu0 %v1802_v22, %s1854_s6  ;;  %1605 = vmatpush1.bf16.msra.mxu0 %v1604_v26 }
 0x1ac   :  { %v808_v52 = vsel %vm807_vm9, %v805_v14, %v1715_v32  ;;  %v809_v43 = vsel %vm807_vm9, %v806_v21, %v1716_v30  ;;  %1624 = vmatpush1.bf16.msra.mxu1 %v2766_v48  ;;  %1606 = vmatprep.subr.bf16.mxu0 %v1858_v49  ;;  %v1655_v32 = vunpack.i.l.bf16 %v2469_v44 }
 0x1ad   :  { %v811_v8 = vsel %vm810_vm11, %v808_v52, %v1720_v55  ;;  %v812_v62 = vsel %vm810_vm11, %v809_v43, %v1721_v2  ;;  %v465_v6 = vpop.permute.xlu0 %464  ;;  %1036 = vrot.lane.b32.xlu1 %v2606_v15, %s1853_s30  ;;  %1616 = vmatprep.subr.bf16.mxu1 %v1858_v49  ;;  %v877_v15 = vsel %vm443_vm14, %v2498_v13, %v2543_v9 }
 0x1ae   :  { %v2844_v48 = vsel %vm813_vm13, %v811_v8, %v1725_v39  ;;  %v2847_v53 = vsel %vm813_vm13, %v812_v62, %v1726_v58 }
 0x1af   :  { %v1158_v60 = vpop.permute.xlu1 %1157  ;;  %1808 = vrot.lane.b32.xlu0 %v1807_v40, %s1859_s14  ;;  %1609 = vmatpush1.bf16.msk.msra.mxu0 %vm2838_vm7, %v1607_v11 }
 0x1b0   :  { %1625 = vmatpush1.bf16.msra.mxu1 %v1601_v27  ;;  %v879_v27 = vsel %vm447_vm15, %v877_v15, %v2550_v63 }
 0x1b1   :  { %v905_v51 = vpop.permute.xlu0 %904  ;;  %1047 = vrot.lane.b32.xlu1 %v2622_v59, %s1854_s6  ;;  %1617 = vmatprep.subr.bf16.mxu1 %v1858_v49  ;;  %v881_v13 = vsel %vm451_vm0, %v879_v27, %v2557_v0  ;;  %v1064_v59 = vsel %vm543_vm10, %v3149_v29, %v1063_v42  ;;  %v878_v0 = vsel %vm443_vm14, %v2489_v41, %v2562_v3 }
 0x1b3   :  { %v1169_v28 = vpop.permute.xlu1 %1168  ;;  %1027 = vrot.lane.b32.xlu0 %v2311_v47, %s1857_s9  ;;  %v883_v47 = vsel %vm455_vm1, %v881_v13, %v2553_v24  ;;  %s1862_s9 = smov 20  }
 0x1b4   :  { %1626 = vmatpush1.bf16.msra.mxu1 %v1604_v26  ;;  %v885_v17 = vsel %vm553_vm2, %v883_v47, %v2565_v46 }
 0x1b5   :  { %v1180_v9 = vpop.permute.xlu0 %1179  ;;  %1058 = vrot.lane.b32.xlu1 %v2612_v5, %s1859_s14  ;;  %1618 = vmatprep.subr.bf16.mxu1 %v1858_v49  ;;  %v880_v49 = vsel %vm447_vm15, %v878_v0, %v2570_v23  ;;  %v887_v24 = vsel %vm792_vm3, %v885_v17, %v2577_v7 }
 0x1b6   :  { %v882_v1 = vsel %vm451_vm0, %v880_v49, %v2581_v45 }
 0x1b7   :  { %v474_v34 = vpop.permute.xlu1 %473  ;;  %1069 = vrot.lane.b32.xlu0 %v1064_v59, %s1860_s28  ;;  %v884_v41 = vsel %vm455_vm1, %v882_v1, %v2594_v31 }
 0x1b8   :  { %v2876_v63 = vsel %vm443_vm14, %v465_v6, %v474_v34  ;;  %1627 = vmatpush1.bf16.msk.msra.mxu1 %vm2838_vm7, %v1607_v11  ;;  %v886_v46 = vsel %vm553_vm2, %v884_v41, %v2600_v4 }
 0x1b9   :  { %v2885_v5 = vpop.permute.xlu0 %462  ;;  %v888_v23 = vsel %vm792_vm3, %v886_v46, %v2614_v10 }
 0x1bb   :  { %v1734_v54 = vpop.permute.xlu1 %1733  ;;  %891 = vrot.lane.b32.xlu0 %v887_v24, %s1861_s4 }
 0x1bc   :  { %v1735_v3 = vunpack.i.l.bf16 %v1734_v54  ;;  %v1736_v7 = vunpack.i.h.bf16 %v1734_v54 }
 0x1bd   :  { %v2898_v22 = vpop.permute.xlu0 %1728 }
 0x1be   :  { %v1076_v19 = vsel %vm443_vm14, %v905_v51, %v1735_v3 }
 0x1bf   :  { %v470_v45 = vpop.permute.xlu1 %469  ;;  %893 = vrot.lane.b32.xlu0 %v888_v23, %s1861_s4 }
 0x1c0   :  { %v2905_v14 = vsel %vm443_vm14, %v1736_v7, %v470_v45 }
 0x1c1   :  { %v928_v21 = vpop.permute.xlu0 %927 }
 0x1c2   :  { %v1079_v31 = vsel %vm447_vm15, %v1076_v19, %v928_v21  ;;  %v1731_v21 = vunpack.i.h.bf16 %v2898_v22 }
 0x1c3   :  { %v1126_v25 = vpop.permute.xlu1 %1125 }
 0x1c4   :  { %v1188_v4 = vsel %vm443_vm14, %v905_v51, %v1126_v25 }
 0x1c5   :  { %v1191_v10 = vsel %vm447_vm15, %v1188_v4, %v2795_v33  ;;  %v1739_v30 = vpop.permute.xlu0 %1738 }
 0x1c6   :  { %v1194_v26 = vsel %vm451_vm0, %v1191_v10, %v2824_v56  ;;  %v1741_v37 = vunpack.i.h.bf16 %v1739_v30  ;;  %v1740_v61 = vunpack.i.l.bf16 %v1739_v30 }
 0x1c7   :  { %v1744_v35 = vpop.permute.xlu1 %1743  ;;  %v1197_v40 = vsel %vm455_vm1, %v1194_v26, %v1158_v60 }
 0x1c8   :  { %v1075_v2 = vsel %vm443_vm14, %v1656_v12, %v1741_v37  ;;  %v1074_v55 = vsel %vm443_vm14, %v1655_v32, %v1740_v61  ;;  %v1746_v58 = vunpack.i.h.bf16 %v1744_v35  ;;  %v1745_v39 = vunpack.i.l.bf16 %v1744_v35 }
 0x1c9   :  { %v1749_v52 = vpop.permute.xlu0 %1748  ;;  %v1200_v33 = vsel %vm553_vm2, %v1197_v40, %v1169_v28 }
 0x1ca   :  { %v1078_v43 = vsel %vm447_vm15, %v1075_v2, %v1746_v58  ;;  %v1077_v44 = vsel %vm447_vm15, %v1074_v55, %v1745_v39  ;;  %v1751_v8 = vunpack.i.h.bf16 %v1749_v52  ;;  %v1750_v56 = vunpack.i.l.bf16 %v1749_v52 }
 0x1cb   :  { %v1203_v62 = vsel %vm792_vm3, %v1200_v33, %v1180_v9  ;;  %v939_v6 = vpop.permute.xlu1 %938 }
 0x1cc   :  { %v1080_v11 = vsel %vm451_vm0, %v1077_v44, %v1750_v56  ;;  %v1081_v36 = vsel %vm451_vm0, %v1078_v43, %v1751_v8  ;;  %1209 = vrot.lane.b32.xlu1 %v1203_v62, %s1861_s4  ;;  %v1082_v60 = vsel %vm451_vm0, %v1079_v31, %v939_v6  ;;  %v1730_v31 = vunpack.i.l.bf16 %v2898_v22  ;;  %v3150_v62 = vld [vmem:[#allocation5_spill] sm:$0xff] }
 0x1cd   :  { %v950_v15 = vpop.permute.xlu0 %949  ;;  %v1404_v6 = vsub.s32 3, %v3150_v62 }
 0x1ce   :  { %v1085_v51 = vsel %vm455_vm1, %v1082_v60, %v950_v15 }
 0x1cf   :  { %v1754_v42 = vpop.permute.xlu1 %1753 }
 0x1d0   :  { %v1756_v28 = vunpack.i.h.bf16 %v1754_v42  ;;  %v1755_v27 = vunpack.i.l.bf16 %v1754_v42 }
 0x1d1   :  { %v1759_v13 = vpop.permute.xlu0 %1758 }
 0x1d2   :  { %v1083_v29 = vsel %vm455_vm1, %v1080_v11, %v1755_v27  ;;  %v1084_v9 = vsel %vm455_vm1, %v1081_v36, %v1756_v28  ;;  %v1761_v59 = vunpack.i.h.bf16 %v1759_v13  ;;  %v1760_v34 = vunpack.i.l.bf16 %v1759_v13  ;;  %v2960_v27 = vld [vmem:[%s3086_s2] sm:$0xf]  ;;  %s1863_s2 = smov 8  }
 0x1d3   :  { %v964_v47 = vpop.permute.xlu1 %963  ;;  %v1405_v13 = vrot.slane %v2960_v27, %v1404_v6 }
 0x1d4   :  { %v1086_v0 = vsel %vm553_vm2, %v1083_v29, %v1760_v34  ;;  %v1087_v17 = vsel %vm553_vm2, %v1084_v9, %v1761_v59  ;;  %v1088_v49 = vsel %vm553_vm2, %v1085_v51, %v964_v47 }
 0x1d5   :  { %v978_v24 = vpop.permute.xlu0 %977 }
 0x1d6   :  { %v1091_v1 = vsel %vm792_vm3, %v1088_v49, %v978_v24 }
 0x1d7   :  { %v1764_v54 = vpop.permute.xlu1 %1763 }
 0x1d8   :  { %v1766_v41 = vunpack.i.h.bf16 %v1764_v54  ;;  %v1765_v3 = vunpack.i.l.bf16 %v1764_v54 }
 0x1d9   :  { %v1769_v46 = vpop.permute.xlu0 %1768 }
 0x1da   :  { %v1089_v23 = vsel %vm792_vm3, %v1086_v0, %v1765_v3  ;;  %v1090_v7 = vsel %vm792_vm3, %v1087_v17, %v1766_v41  ;;  %v1771_v19 = vunpack.i.h.bf16 %v1769_v46  ;;  %v1770_v45 = vunpack.i.l.bf16 %v1769_v46 }
 0x1db   :  { %v992_v25 = vpop.permute.xlu1 %991 }
 0x1dc   :  { %v1092_v4 = vsel %vm795_vm4, %v1089_v23, %v1770_v45  ;;  %v1093_v12 = vsel %vm795_vm4, %v1090_v7, %v1771_v19  ;;  %v1094_v10 = vsel %vm795_vm4, %v1091_v1, %v992_v25 }
 0x1dd   :  { %v472_v30 = vpop.permute.xlu0 %471  ;;  %v1095_v32 = vsel %vm798_vm5, %v1092_v4, %v1730_v31  ;;  %v1096_v26 = vsel %vm798_vm5, %v1093_v12, %v1731_v21  ;;  %v1097_v37 = vsel %vm798_vm5, %v1094_v10, %v2770_v57  ;;  %vm1480_vm5 = vcmask 261120  }
 0x1df   :  { %v1130_v61 = vpop.permute.xlu1 %1129 }
 0x1e1   :  { %v1122_v35 = vpop.permute.xlu0 %1121 }
 0x1e2   :  { %v1190_v44 = vsel %vm443_vm14, %v1122_v35, %v1130_v61  ;;  %v521_v35 = vsel %vm443_vm14, %v2885_v5, %v472_v30 }
 0x1e3   :  { %v1139_v40 = vpop.permute.xlu1 %1138 }
 0x1e4   :  { %v1193_v60 = vsel %vm447_vm15, %v1190_v44, %v1139_v40 }
 0x1e5   :  { %v1128_v2 = vpop.permute.xlu0 %1127 }
 0x1e6   :  { %v1189_v43 = vsel %vm443_vm14, %v2752_v38, %v1128_v2  ;;  %vm816_vm14 = vcmask 687104  }
 0x1e7   :  { %v1151_v22 = vpop.permute.xlu1 %1150 }
 0x1e8   :  { %v1196_v51 = vsel %vm451_vm0, %v1193_v60, %v1151_v22 }
 0x1e9   :  { %v1137_v55 = vpop.permute.xlu0 %1136 }
 0x1ea   :  { %v1192_v8 = vsel %vm447_vm15, %v1189_v43, %v1137_v55 }
 0x1eb   :  { %v1162_v58 = vpop.permute.xlu1 %1161 }
 0x1ec   :  { %v1199_v28 = vsel %vm455_vm1, %v1196_v51, %v1162_v58 }
 0x1ed   :  { %v1149_v39 = vpop.permute.xlu0 %1148 }
 0x1ee   :  { %v1195_v57 = vsel %vm451_vm0, %v1192_v8, %v1149_v39 }
 0x1ef   :  { %v1173_v52 = vpop.permute.xlu1 %1172 }
 0x1f0   :  { %v1202_v29 = vsel %vm553_vm2, %v1199_v28, %v1173_v52 }
 0x1f1   :  { %v1160_v33 = vpop.permute.xlu0 %1159 }
 0x1f2   :  { %v1198_v11 = vsel %vm455_vm1, %v1195_v57, %v1160_v33 }
 0x1f3   :  { %v1182_v56 = vpop.permute.xlu1 %1181 }
 0x1f5   :  { %v1171_v36 = vpop.permute.xlu0 %1170 }
 0x1f6   :  { %v1201_v15 = vsel %vm553_vm2, %v1198_v11, %v1171_v36 }
 0x1f7   :  { %v486_v42 = vpop.permute.xlu1 %485  ;;  %v1204_v38 = vsel %vm792_vm3, %v1201_v15, %v1182_v56 }
 0x1f8   :  { %1211 = vrot.lane.b32.xlu0 %v1204_v38, %s1861_s4  ;;  %v524_v2 = vsel %vm447_vm15, %v521_v35, %v486_v42 }
 0x1f9   :  { %v1184_v9 = vpop.permute.xlu0 %1183 }
 0x1fa   :  { %v1205_v59 = vsel %vm792_vm3, %v1202_v29, %v1184_v9  ;;  %vm3152_vm3 = vmmov %vm3151_vm12 }
 0x1fb   :  { %v1779_v34 = vpop.permute.xlu1 %1778  ;;  %1213 = vrot.lane.b32.xlu1 %v1205_v59, %s1861_s4  ;;  %vm3153_vm4 = vmmov %vm3152_vm3 }
 0x1fc   :  { %v1781_v47 = vunpack.i.h.bf16 %v1779_v34  ;;  %v1780_v0 = vunpack.i.l.bf16 %v1779_v34  ;;  %1407 = vrot.lane.b32.xlu0 %v1405_v13, %s1862_s9 }
 0x1fd   :  { %v484_v17 = vpop.permute.xlu0 %483 }
 0x1fe   :  { %v1099_v49 = vsel %vm801_vm6, %v1096_v26, %v1781_v47  ;;  %v1098_v24 = vsel %vm801_vm6, %v1095_v32, %v1780_v0  ;;  %v523_v58 = vsel %vm447_vm15, %v2905_v14, %v484_v17 }
 0x1ff   :  { %v500_v1 = vpop.permute.xlu1 %499 }
 0x200   :  { %v527_v22 = vsel %vm451_vm0, %v524_v2, %v500_v1 }
 0x201   :  { %v2968_v54 = vpop.permute.xlu0 %1773 }
 0x203   :  { %v1789_v41 = vpop.permute.xlu1 %1788 }
 0x204   :  { %v1791_v3 = vunpack.i.h.bf16 %v1789_v41  ;;  %v1790_v46 = vunpack.i.l.bf16 %v1789_v41 }
 0x205   :  { %v1010_v23 = vpop.permute.xlu0 %1009 }
 0x206   :  { %v1101_v7 = vsel %vm3151_vm12, %v1098_v24, %v1790_v46  ;;  %v1102_v19 = vsel %vm3152_vm3, %v1099_v49, %v1791_v3  ;;  %v1100_v45 = vsel %vm801_vm6, %v1097_v37, %v1010_v23 }
 0x207   :  { %v514_v21 = vpop.permute.xlu1 %513 }
 0x208   :  { %v530_v39 = vsel %vm455_vm1, %v527_v22, %v514_v21  ;;  %v1775_v21 = vunpack.i.l.bf16 %v2968_v54 }
 0x209   :  { %v498_v31 = vpop.permute.xlu0 %497  ;;  %v545_v44 = vrot.slane %v530_v39, 7 }
 0x20a   :  { %v526_v52 = vsel %vm451_vm0, %v523_v58, %v498_v31 }
 0x20b   :  { %v1794_v25 = vpop.permute.xlu1 %1793 }
 0x20c   :  { %v1796_v4 = vunpack.i.h.bf16 %v1794_v25  ;;  %v1795_v12 = vunpack.i.l.bf16 %v1794_v25 }
 0x20d   :  { %v2973_v10 = vpop.permute.xlu0 %1783 }
 0x20e   :  { %v1104_v32 = vsel %vm807_vm9, %v1101_v7, %v1795_v12  ;;  %v1105_v26 = vsel %vm807_vm9, %v1102_v19, %v1796_v4  ;;  %v1785_v25 = vunpack.i.l.bf16 %v2973_v10  ;;  %v1786_v35 = vunpack.i.h.bf16 %v2973_v10 }
 0x20f   :  { %v1814_v61 = vpop.permute.xlu1 %1813  ;;  %v551_v10 = vsub.s32 1, %v3150_v62 }
 0x210   :  { %v1816_v17 = vunpack.i.h.bf16 %v1814_v61  ;;  %v1815_v49 = vunpack.i.l.bf16 %v1814_v61  ;;  %v817_v61 = vsel %vm816_vm14, %v2844_v48, %v1775_v21 }
 0x211   :  { %v1019_v40 = vpop.permute.xlu0 %1018 }
 0x212   :  { %v1103_v37 = vsel %vm3153_vm4, %v1100_v45, %v1019_v40 }
 0x213   :  { %v488_v55 = vpop.permute.xlu1 %487 }
 0x214   :  { %v525_v57 = vsel %vm447_vm15, %v2876_v63, %v488_v55  ;;  %vm819_vm15 = vcmask 736256  }
 0x215   :  { %v512_v33 = vpop.permute.xlu0 %511  ;;  %v820_v2 = vsel %vm819_vm15, %v817_v61, %v1785_v25  ;;  %v3154_v25 = vld [vmem:[#allocation9_spill] sm:$0xff]  ;;  %v1391_v61 = vmul.f32 0.33333334, %v2336_v20  ;;  %v3155_v20 = vld [vmem:[#allocation8_spill] sm:$0xff] }
 0x216   :  { %v529_v43 = vsel %vm455_vm1, %v526_v52, %v512_v33 }
 0x217   :  { %v544_v5 = vrot.slane %v529_v43, 7  ;;  %v502_v30 = vpop.permute.xlu1 %501 }
 0x218   :  { %v528_v14 = vsel %vm451_vm0, %v525_v57, %v502_v30  ;;  %vm1240_vm0 = vcmask 80896  }
 0x219   :  { %v1799_v8 = vpop.permute.xlu0 %1798  ;;  %v546_v56 = vsel %vm543_vm10, %v544_v5, %v545_v44 }
 0x21a   :  { %v1801_v6 = vunpack.i.h.bf16 %v1799_v8  ;;  %v1800_v11 = vunpack.i.l.bf16 %v1799_v8  ;;  %1569 = vmatprep.mubr.msk.f32.mxu1 %vm553_vm2, %v546_v56  ;;  %v552_v8 = vrot.slane %v2960_v27, %v551_v10 }
 0x21b   :  { %v516_v36 = vpop.permute.xlu1 %515 }
 0x21c   :  { %v1108_v60 = vsel %vm810_vm11, %v1105_v26, %v1801_v6  ;;  %v1107_v15 = vsel %vm810_vm11, %v1104_v32, %v1800_v11  ;;  %v531_v51 = vsel %vm455_vm1, %v528_v14, %v516_v36  ;;  %v1776_v26 = vunpack.i.h.bf16 %v2968_v54 }
 0x21d   :  { %v547_v42 = vrot.slane %v531_v51, 7  ;;  %v1804_v38 = vpop.permute.xlu0 %1803 }
 0x21e   :  { %v1806_v28 = vunpack.i.h.bf16 %v1804_v38  ;;  %v1805_v13 = vunpack.i.l.bf16 %v1804_v38  ;;  %v818_v22 = vsel %vm816_vm14, %v2847_v53, %v1776_v26 }
 0x21f   :  { %v1037_v29 = vpop.permute.xlu1 %1036  ;;  %v548_v63 = vsel %vm543_vm10, %v545_v44, %v547_v42  ;;  %vm897_vm10 = vcmask 785408   ;;  %v821_v58 = vsel %vm819_vm15, %v818_v22, %v1786_v35 }
 0x220   :  { %v1110_v9 = vsel %vm813_vm13, %v1107_v15, %v1805_v13  ;;  %v1111_v59 = vsel %vm813_vm13, %v1108_v60, %v1806_v28  ;;  %1570 = vmatmul.mubr.msk.f32.gmra.mrb[2].mxu1 %vm553_vm2, %v548_v63  ;;  %vm1471_vm2 = vcmask 130048  }
 0x221   :  { %v1809_v34 = vpop.permute.xlu0 %1808 }
 0x222   :  { %v1811_v47 = vunpack.i.h.bf16 %v1809_v34  ;;  %v1810_v0 = vunpack.i.l.bf16 %v1809_v34 }
 0x223   :  { %v1048_v24 = vpop.permute.xlu1 %1047 }
 0x224   :  { %v1113_v1 = vsel %vm816_vm14, %v1110_v9, %v1810_v0  ;;  %v1114_v41 = vsel %vm816_vm14, %v1111_v59, %v1811_v47 }
 0x225   :  { %v1028_v3 = vpop.permute.xlu0 %1027  ;;  %v1116_v46 = vsel %vm819_vm15, %v1113_v1, %v1815_v49  ;;  %v1117_v23 = vsel %vm819_vm15, %v1114_v41, %v1816_v17 }
 0x226   :  { %v1106_v7 = vsel %vm807_vm9, %v1103_v37, %v1028_v3 }
 0x227   :  { %v1109_v19 = vsel %vm810_vm11, %v1106_v7, %v1037_v29  ;;  %v1059_v45 = vpop.permute.xlu1 %1058 }
 0x228   :  { %v1112_v31 = vsel %vm813_vm13, %v1109_v19, %v1048_v24  ;;  %v1238_v24 = vsub.s32 2, %v3150_v62 }
 0x229   :  { %v1115_v4 = vsel %vm816_vm14, %v1112_v31, %v1059_v45  ;;  %v1070_v12 = vpop.permute.xlu0 %1069 }
 0x22a   :  { %v1118_v32 = vsel %vm819_vm15, %v1115_v4, %v1070_v12  ;;  %v1239_v1 = vrot.slane %v2960_v27, %v1238_v24  ;;  %v1390_v4 = vmul.f32 0.33333334, %v3154_v25 }
 0x22d   :  { %v892_v40 = vpop.permute.xlu0 %891 }
 0x22e   :  { %v898_v37 = vsel %vm897_vm10, %v820_v2, %v892_v40  ;;  %1518 = vmatprep.mubr.msk.f32.mxu0 %vm1240_vm0, %v892_v40 }
 0x22f   :  { %1317 = vmatmul.mubr.f32.vlgmr.msra.gmra.mrb[10].mxu0 %v898_v37 }
 0x231   :  { %v894_v55 = vpop.permute.xlu0 %893 }
 0x232   :  { %1519 = vmatprep.mubr.msk.f32.mxu0 %vm1240_vm0, %v894_v55  ;;  %v899_v48 = vsel %vm897_vm10, %v821_v58, %v894_v55 }
 0x233   :  { %1322 = vmatmul.mubr.f32.gmra.mrb[12].mxu0 %v899_v48 }
 0x23e   :  { %v1210_v54 = vpop.permute.xlu1 %1209 }
 0x23f   :  { %v1218_v39 = vsel %vm897_vm10, %v1116_v46, %v1210_v54  ;;  %v1227_v43 = vrot.slane %v1210_v54, 6 }
 0x240   :  { %v1224_v30 = vrot.slane %v1218_v39, 6 }
 0x26a   :  { %v1568_v52 = vpop.f32.mrb[0].mxu1  ;;  %v1212_v33 = vpop.permute.xlu0 %1211 }
 0x26b   :  { %v1219_v44 = vsel %vm897_vm10, %v1117_v23, %v1212_v33  ;;  %v1228_v5 = vrot.slane %v1212_v33, 6  ;;  %v631_v53 = vpop.f32.mrb[1].mxu1  ;;  %v637_v38 = vadd.f32 %v1568_v52, %v552_v8 }
 0x26c   :  { %v1225_v56 = vrot.slane %v1219_v44, 6  ;;  %v632_v13 = vadd.f32 %v631_v53, %v552_v8  ;;  %v3156_v53 = vld [vmem:[#allocation6_spill] sm:$0xff] }
 0x26d   :  { %v1214_v57 = vpop.permute.xlu1 %1213  ;;  %v1229_v6 = vsel %vm705_vm8, %v1227_v43, %v1228_v5  ;;  %v651_v59 = vmax.f32 %v637_v38, 0.0 }
 0x26e   :  { %v1220_v11 = vsel %vm897_vm10, %v1118_v32, %v1214_v57  ;;  %v1232_v14 = vrot.slane %v1214_v57, 6  ;;  %v1408_v36 = vpop.permute.xlu0 %1407  ;;  %1520 = vmatprep.mubr.msk.f32.mxu0 %vm1240_vm0, %v1229_v6  ;;  %v1226_v60 = vsel %vm705_vm8, %v1224_v30, %v1225_v56 }
 0x26f   :  { %v1230_v15 = vrot.slane %v1220_v11, 6  ;;  %v1410_v51 = vadd.f32 %v1408_v36, %v2356_v16  ;;  %v1411_v42 = vadd.f32 %v1408_v36, %v2339_v50  ;;  %1327 = vmatmul.mubr.f32.gmra.mrb[14].mxu0 %v1226_v60  ;;  %v650_v16 = vmax.f32 %v632_v13, 0.0 }
 0x270   :  { %v1233_v28 = vsel %vm705_vm8, %v1228_v5, %v1232_v14  ;;  %v1412_v62 = vadd.f32 %v1408_v36, %v1390_v4  ;;  %v1413_v2 = vadd.f32 %v1408_v36, %v1391_v61 }
 0x271   :  { %v1414_v29 = vmax.f32 %v1410_v51, 0.0  ;;  %v1415_v63 = vmax.f32 %v1411_v42, 0.0  ;;  %1521 = vmatprep.mubr.msk.f32.mxu1 %vm1240_vm0, %v1233_v28  ;;  %v1231_v9 = vsel %vm705_vm8, %v1225_v56, %v1230_v15  ;;  %vm1466_vm8 = vcmask 64512   ;;  %v3157_v51 = vld [vmem:[#allocation13_spill] sm:$0xff] }
 0x272   :  { %1332 = vmatmul.mubr.f32.vlgmr.msra.gmra.mrb[4].mxu1 %v1231_v9  ;;  %v1416_v22 = vmax.f32 %v1412_v62, 0.0  ;;  %v1417_v55 = vmax.f32 %v1413_v2, 0.0 }
 0x273   :  { %1456 = vrot.lane.b32.xlu0 %v1415_v63, %s1847_s19  ;;  %1454 = vrot.lane.b32.xlu1 %v1414_v29, %s1847_s19 }
 0x277   :  { %1424 = vrot.lane.b32.xlu0 %v651_v59, %s1863_s2  ;;  %1422 = vrot.lane.b32.xlu1 %v650_v16, %s1863_s2 }
 0x2e5   :  { %v1455_v58 = vpop.permute.xlu1 %1454  ;;  %v1457_v48 = vpop.permute.xlu0 %1456 }
 0x2e9   :  { %v1423_v54 = vpop.permute.xlu1 %1422  ;;  %v1425_v10 = vpop.permute.xlu0 %1424 }
 0x2ea   :  { %v1467_v52 = vsel %vm1466_vm8, %v3155_v20, %v1423_v54  ;;  %v1468_v30 = vsel %vm1466_vm8, %v3156_v53, %v1425_v10 }
 0x2f3   :  { %v1571_v50 = vpop.f32.mrb[2].mxu1 }
 0x2f4   :  { %v647_v34 = vadd.f32 %v1571_v50, %v552_v8  ;;  %v641_v47 = vpop.f32.mrb[3].mxu1 }
 0x2f5   :  { %v642_v0 = vadd.f32 %v641_v47, %v552_v8 }
 0x2f6   :  { %v653_v17 = vmax.f32 %v647_v34, 0.0 }
 0x2f7   :  { %v652_v49 = vmax.f32 %v642_v0, 0.0 }
 0x2f8   :  { %1428 = vrot.lane.b32.xlu0 %v653_v17, %s1863_s2 }
 0x2f9   :  { %1426 = vrot.lane.b32.xlu1 %v652_v49, %s1863_s2 }
 0x302   :  { %v1318_v41 = vpop.f32.mrb[10].mxu0 }
 0x303   :  { %v1319_v3 = vadd.f32 %v1318_v41, %v1239_v1  ;;  %v1320_v46 = vpop.f32.mrb[11].mxu0 }
 0x305   :  { %v1337_v23 = vmax.f32 %v1319_v3, 0.0 }
 0x306   :  { %v1323_v7 = vpop.f32.mrb[12].mxu0 }
 0x307   :  { %v1324_v19 = vadd.f32 %v1323_v7, %v1239_v1  ;;  %v1325_v45 = vpop.f32.mrb[13].mxu0  ;;  %1438 = vrot.lane.b32.xlu1 %v1337_v23, %s1849_s21 }
 0x309   :  { %v1338_v21 = vmax.f32 %v1324_v19, 0.0 }
 0x30b   :  { %1440 = vrot.lane.b32.xlu0 %v1338_v21, %s1849_s21 }
 0x342   :  { %v1328_v31 = vpop.f32.mrb[14].mxu0 }
 0x343   :  { %v1329_v12 = vadd.f32 %v1328_v31, %v1239_v1  ;;  %v1330_v32 = vpop.f32.mrb[15].mxu0 }
 0x345   :  { %v1339_v26 = vmax.f32 %v1329_v12, 0.0  ;;  %v1333_v27 = vpop.f32.mrb[4].mxu1 }
 0x346   :  { %v1334_v35 = vadd.f32 %v1333_v27, %v1239_v1  ;;  %v1335_v40 = vpop.f32.mrb[5].mxu1 }
 0x347   :  { %1442 = vrot.lane.b32.xlu1 %v1339_v26, %s1849_s21 }
 0x348   :  { %v1340_v37 = vmax.f32 %v1334_v35, 0.0 }
 0x34a   :  { %1444 = vrot.lane.b32.xlu0 %v1340_v37, %s1849_s21 }
 0x34b   :  { %1458 = vrot.lane.b32.xlu1 %v1416_v22, %s1847_s19 }
 0x34e   :  { %1460 = vrot.lane.b32.xlu0 %v1417_v55, %s1847_s19  ;;  %s1864_s19 = smov [#allocation2]  }
 0x34f   :  { %s1490_s21 = sshll.u32 %s1864_s19, 4  ;;  %s1491_s21 = int_to_ptr.vmem [resolvable:$true] %s1490_s21 }
 0x350   :  { %s1818_s14 = scalar_lea.vmem %s1491_s21, 512  ;;  %p1823_p1 = scmp.lt.s32.totalorder %s1491_s21, %s1491_s21 }
 0x351   :  { %p1819_p0 = scmp.ne.s32.totalorder %s1491_s21, %s1818_s14  ;;  %p1824_p2 = scmp.lt.s32.totalorder %s1818_s14, %s1818_s14 }
 0x353   :  { %p1825_p3 = por %p1824_p2, %p1823_p1 }
 0x355   :  { %p1826_p4 = pnand %p1825_p3, %p1819_p0 }
 0x36a   :  { %v1429_v33 = vpop.permute.xlu0 %1428 }
 0x36b   :  { %v1427_v39 = vpop.permute.xlu1 %1426  ;;  %v1470_v42 = vsel %vm1466_vm8, %v3157_v51, %v1429_v33 }
 0x36c   :  { %v1469_v11 = vsel %vm1466_vm8, %v2483_v18, %v1427_v39 }
 0x379   :  { %v1439_v43 = vpop.permute.xlu1 %1438 }
 0x37a   :  { %v1472_v44 = vsel %vm1471_vm2, %v1467_v52, %v1439_v43 }
 0x37b   :  { %v1476_v5 = vsel %vm455_vm1, %v1472_v44, %v1455_v58 }
 0x37c   :  { %1481 = vst.msk [vmem:[#allocation2] sm:$0xff] %vm1480_vm5, %v1476_v5 }
 0x37d   :  { %v1441_v8 = vpop.permute.xlu0 %1440 }
 0x37e   :  { %v1473_v56 = vsel %vm1471_vm2, %v1468_v30, %v1441_v8 }
 0x37f   :  { %v1477_v57 = vsel %vm455_vm1, %v1473_v56, %v1457_v48 }
 0x380   :  { %1482 = vst.msk [vmem:[#allocation2 + $0x8] sm:$0xff] %vm1480_vm5, %v1477_v57 }
 0x3b9   :  { %v1443_v6 = vpop.permute.xlu1 %1442 }
 0x3ba   :  { %v1474_v36 = vsel %vm1471_vm2, %v1469_v11, %v1443_v6 }
 0x3bc   :  { %v1445_v14 = vpop.permute.xlu0 %1444 }
 0x3bd   :  { %v1459_v60 = vpop.permute.xlu1 %1458  ;;  %v1475_v38 = vsel %vm1471_vm2, %v1470_v42, %v1445_v14 }
 0x3be   :  { %v1478_v15 = vsel %vm455_vm1, %v1474_v36, %v1459_v60 }
 0x3bf   :  { %1483 = vst.msk [vmem:[#allocation2 + $0x10] sm:$0xff] %vm1480_vm5, %v1478_v15 }
 0x3c0   :  { %v1461_v28 = vpop.permute.xlu0 %1460 }
 0x3c1   :  { %v1479_v13 = vsel %vm455_vm1, %v1475_v38, %v1461_v28 }
 0x3c2   :  { %1484 = vst.msk [vmem:[#allocation2 + $0x18] sm:$0xff] %vm1480_vm5, %v1479_v13 }
 0x3c3   :  { %1829 = shalt.err (!%p1826_p4)
}
 0x3c4   :  { %s1830_s29 = scalar_lea.hbm %s3089_s5, 512 }
 0x3c5   :  { %p1831_p5 = scmp.ne.s32.totalorder %s3089_s5, %s1830_s29  ;;  %p1834_p6 = scmp.lt.u32.totalorder %s1830_s29, %s3089_s5 }
 0x3c7   :  { %p1836_p7 = pnand %p1834_p6, %p1831_p5 }
 0x3c9   :  { %1839 = shalt.err (!%p1836_p7)
}
 0x3ca   :  { %s1865_s12 = smov 128  }
 0x3cb   :  { %1496 = dma.vmem_to_hbm [thread:$0]  %s1491_s21, 512, %s3089_s5, [#allocation3], %s1865_s12, %s1865_s12, %s1863_s2  }
 0x3cc   :  { %1840 = dma.done.wait [#allocation3], 512  }
 0x3cd   :  { %1841 = vsyncadd [#allocation3], 4294966784 }
 0x3ce   :  { %1500 = vsyncpa [#allocation3], 1 }

</bundles_post_ra>
